<compile_context>
chip_gen: v5e
topology: v5e:2x2
jax: 0.10.0
libtpu: 0.0.40
codegen_flags: <defaults>
</compile_context>

<pallas_src>
import functools

import jax
import jax.numpy as jnp
from jax.experimental import pallas as pl
from jax.experimental.pallas import tpu as pltpu

# ----------------------------- configuration --------------------------------
EMBEDDING_DIM = 32
H_DIM = 32
BOTTLENECK_DIM = 128          # lane-dense (128-wide) final store
NMP_LAYERS = 3                # -> 2*(NMP_LAYERS-1) = 4 nmp mlps
MLP_HIDDEN = 128
BN_EPS = 1e-5

NUM_NMP_MLPS = 2 * (NMP_LAYERS - 1)
# flat weight-list layout (kernel order)
_W_SPATIAL = 0                                   # spatial_w, spatial_b (f32, VPU path)
_W_START = 2                                     # mlp_start: w1,b1,w2,b2
_W_NMP = 6                                       # 4 tensors per nmp mlp
_W_END = _W_NMP + 4 * NUM_NMP_MLPS               # mlp_end: w1,b1,w2,b2
NUM_WEIGHTS = _W_END + 4


# ------------------------------ fused kernel ---------------------------------
def _nmpnet_kernel(n_ref, h_ref, pos_ref, *refs, max_n):
    """One grid step == one scene. refs = (*weights, out_ref)."""
    out_ref = refs[-1]
    w = refs[:-1]
    N = max_n
    n_valid = n_ref[pl.program_id(0)]            # true #peds in this scene (SMEM)

    # --- graph plumbing: pure sublane broadcast / concat / slice (VPU/XLU) ----
    def tile_rows(x):        # edge e -> x[e % N]  (receivers, == rel_rec @ x)
        return jnp.concatenate([x] * N, axis=0)

    def repeat_rows(x):      # edge e -> x[e // N] (senders,   == rel_send @ x)
        return jnp.concatenate(
            [jnp.broadcast_to(x[i:i + 1, :], (N, x.shape[1])) for i in range(N)],
            axis=0)

    def node2edge(x):        # (N, D) -> (N*N, 2D): cat([receivers, senders], 1)
        return jnp.concatenate([tile_rows(x), repeat_rows(x)], axis=1)

    def edge2node(e):        # (N*N, D) -> (N, D): masked sum over senders, /D
        d = e.shape[1]
        acc = jnp.zeros((N, d), jnp.float32)
        for si in range(N):  # mask padded senders so padding never leaks in
            m = (si < n_valid).astype(jnp.float32)
            acc = acc + e[si * N:(si + 1) * N, :] * m
        return acc * (1.0 / d)          # reference divides by incoming.size(1)=D

    # --- fused 2-layer MLP (BN already folded); bf16 MXU, f32 accumulate ------
    def mlp2(x, w1, b1, w2, b2, relu):
        y = jnp.dot(x.astype(jnp.bfloat16), w1[...],
                    preferred_element_type=jnp.float32) + b1[...]
        if relu:
            y = jnp.maximum(y, 0.0)
        y = jnp.dot(y.astype(jnp.bfloat16), w2[...],
                    preferred_element_type=jnp.float32) + b2[...]
        if relu:
            y = jnp.maximum(y, 0.0)
        return y

    h = h_ref[...]                                   # (N, H)   f32
    pos = pos_ref[...]                               # (N, 2)   f32

    # relative positions: pos[receiver] - pos[sender]
    rel_pos = tile_rows(pos) - repeat_rows(pos)      # (N*N, 2)
    # spatial embedding: K=2 matmul done as two VPU FMAs (no MXU pass)
    sw = w[_W_SPATIAL][...]                          # (2, E) f32
    sb = w[_W_SPATIAL + 1][...]                      # (1, E) f32
    rel_emb = (rel_pos[:, 0:1] * sw[0:1, :]
               + rel_pos[:, 1:2] * sw[1:2, :] + sb)  # (N*N, E)

    # nmp_mlp_start on edges (activation=None -> no ReLU)
    edge_in = jnp.concatenate([node2edge(h), rel_emb], axis=1)   # (N*N, 2H+E)
    edge_feat = mlp2(edge_in, w[_W_START], w[_W_START + 1],
                     w[_W_START + 2], w[_W_START + 3], relu=False)

    node_feat = None
    for l in range(NUM_NMP_MLPS):                    # fully unrolled (4 mlps)
        wi = _W_NMP + 4 * l
        if l % 2 == 0:
            node_feat = mlp2(edge2node(edge_feat),
                             w[wi], w[wi + 1], w[wi + 2], w[wi + 3], relu=False)
        else:
            edge_feat = mlp2(node2edge(node_feat),
                             w[wi], w[wi + 1], w[wi + 2], w[wi + 3], relu=False)

    # nmp_mlp_end (activation='relu' -> ReLU after each Linear+BN)
    out = mlp2(edge2node(edge_feat), w[_W_END], w[_W_END + 1],
               w[_W_END + 2], w[_W_END + 3], relu=True)          # (N, 128) f32
    out_ref[...] = out.astype(out_ref.dtype)


def _cost_estimate(num_scenes, max_n, weights):
    ne = max_n * max_n

    def mlp_flops(rows, din, dout):
        return 2 * rows * (din * MLP_HIDDEN + MLP_HIDDEN * dout)

    per_scene = 2 * ne * 2 * EMBEDDING_DIM                       # spatial FMAs
    per_scene += mlp_flops(ne, 2 * H_DIM + EMBEDDING_DIM, H_DIM)
    for l in range(NUM_NMP_MLPS):
        per_scene += (mlp_flops(max_n, H_DIM, H_DIM) if l % 2 == 0
                      else mlp_flops(ne, 2 * H_DIM, H_DIM))
    per_scene += mlp_flops(max_n, H_DIM, BOTTLENECK_DIM)
    flops = num_scenes * per_scene
    bytes_w = sum(int(x.size) * int(x.dtype.itemsize) for x in weights)
    bytes_io = num_scenes * max_n * (H_DIM + 2 + BOTTLENECK_DIM) * 4
    return int(flops), int(bytes_w + bytes_io)


def _nmpnet_pallas(n_arr, h_pad, pos_pad, weights, max_n):
    assert len(weights) == NUM_WEIGHTS
    num_scenes = h_pad.shape[0]

    scene_spec = lambda feat: pl.BlockSpec((None, max_n, feat),
                                           lambda s, n_ref: (s, 0, 0))
    # constant index_map -> weights DMA'd once and stay resident across scenes
    weight_specs = [pl.BlockSpec(x.shape, lambda s, n_ref: (0, 0)) for x in weights]

    grid_spec = pltpu.PrefetchScalarGridSpec(
        num_scalar_prefetch=1,
        grid=(num_scenes,),
        in_specs=[scene_spec(H_DIM), scene_spec(2)] + weight_specs,
        out_specs=pl.BlockSpec((None, max_n, BOTTLENECK_DIM),
                               lambda s, n_ref: (s, 0, 0)),
    )
    flops, bytes_accessed = _cost_estimate(num_scenes, max_n, weights)
    return pl.pallas_call(
        functools.partial(_nmpnet_kernel, max_n=max_n),
        out_shape=jax.ShapeDtypeStruct((num_scenes, max_n, BOTTLENECK_DIM),
                                       jnp.float32),
        grid_spec=grid_spec,
        compiler_params=pltpu.CompilerParams(
            dimension_semantics=("parallel",)),        # scenes shard across TCs
        cost_estimate=pl.CostEstimate(flops=flops, transcendentals=0,
                                      bytes_accessed=bytes_accessed),
    )(n_arr, h_pad, pos_pad, *weights)


# --------------------------- parameter construction --------------------------
def _init_linear(key, din, dout):
    kw, kb = jax.random.split(key)
    lim = 1.0 / jnp.sqrt(jnp.float32(din))
    w = jax.random.uniform(kw, (dout, din), jnp.float32, -lim, lim)
    b = jax.random.uniform(kb, (dout,), jnp.float32, -lim, lim)
    return w, b


def _init_bn(key, d):
    kg, kb, km, kv = jax.random.split(key, 4)
    gamma = 1.0 + 0.1 * jax.random.normal(kg, (d,), jnp.float32)
    beta = 0.1 * jax.random.normal(kb, (d,), jnp.float32)
    mean = 0.1 * jax.random.normal(km, (d,), jnp.float32)
    var = 1.0 + 0.1 * jax.random.uniform(kv, (d,), jnp.float32)
    return gamma, beta, mean, var


def _fold_linear_bn(key, din, dout, batch_norm=True):
    """Linear(din,dout) [+ folded eval-mode BatchNorm1d(dout)], pre-transposed."""
    k1, k2 = jax.random.split(key)
    w, b = _init_linear(k1, din, dout)
    wt = w.T                                          # (din, dout) -> x @ wt
    if batch_norm:
        gamma, beta, mean, var = _init_bn(k2, dout)
        scale = gamma / jnp.sqrt(var + BN_EPS)
        wt = wt * scale[None, :]
        b = (b - mean) * scale + beta
    return wt, b.reshape(1, dout)


def _make_mlp_weights(key, dims):
    """make_mlp with two Linear(+BN) blocks; weights bf16 for the MXU."""
    k0, k1 = jax.random.split(key)
    w1, b1 = _fold_linear_bn(k0, dims[0], dims[1])
    w2, b2 = _fold_linear_bn(k1, dims[1], dims[2])
    return [w1.astype(jnp.bfloat16), b1, w2.astype(jnp.bfloat16), b2]


def init_nmpnet_params(key):
    n_mlps = 2 + NUM_NMP_MLPS                         # start + nmp mlps + end
    keys = jax.random.split(key, 1 + n_mlps)
    weights = []
    sw, sb = _fold_linear_bn(keys[0], 2, EMBEDDING_DIM, batch_norm=False)
    weights += [sw, sb]                               # f32 (VPU-only path)
    weights += _make_mlp_weights(
        keys[1], [2 * H_DIM + EMBEDDING_DIM, MLP_HIDDEN, H_DIM])   # nmp_mlp_start
    for i in range(NMP_LAYERS - 1):
        weights += _make_mlp_weights(keys[2 + 2 * i], [H_DIM, MLP_HIDDEN, H_DIM])
        weights += _make_mlp_weights(keys[3 + 2 * i], [2 * H_DIM, MLP_HIDDEN, H_DIM])
    weights += _make_mlp_weights(keys[-1], [H_DIM, MLP_HIDDEN, BOTTLENECK_DIM])
    assert len(weights) == NUM_WEIGHTS
    return weights


# --------------------------------- forward -----------------------------------
@functools.partial(jax.jit, static_argnames=("seq_start_end",))
def nmpnet_forward(params, h_states, seq_start_end, end_pos):
    """
    h_states: (num_layers, batch, H_DIM); end_pos: (batch, 2)
    seq_start_end: static tuple of (start, end) pairs
    returns: (batch, BOTTLENECK_DIM)
    """
    sizes = tuple(int(e) - int(s) for s, e in seq_start_end)
    num_scenes = len(seq_start_end)
    max_n = max(sizes)

    h_flat = h_states.reshape(-1, H_DIM).astype(jnp.float32)
    # pad every scene to max_n (zeros are masked out inside the kernel)
    h_pad = jnp.zeros((num_scenes, max_n, H_DIM), jnp.float32)
    pos_pad = jnp.zeros((num_scenes, max_n, 2), jnp.float32)
    for i, (s, e) in enumerate(seq_start_end):
        n = sizes[i]
        h_pad = h_pad.at[i, :n, :].set(h_flat[s:e])
        pos_pad = pos_pad.at[i, :n, :].set(end_pos[s:e].astype(jnp.float32))
    n_arr = jnp.asarray(sizes, dtype=jnp.int32)

    out_pad = _nmpnet_pallas(n_arr, h_pad, pos_pad, list(params), max_n)

    # drop padded rows and restore original batch order
    pieces = [out_pad[i, :sizes[i], :] for i in range(num_scenes)]
    return jnp.concatenate(pieces, axis=0)


# ----------------------------------- main -------------------------------------
if __name__ == "__main__":
    key = jax.random.PRNGKey(0)
    kp, kh, ke = jax.random.split(key, 3)

    params = init_nmpnet_params(kp)

    batch = 8
    num_layers = 1
    h_states = jax.random.normal(kh, (num_layers, batch, H_DIM), jnp.float32)
    end_pos = jax.random.normal(ke, (batch, 2), jnp.float32)
    seq_start_end = ((0, 4), (4, 8))    # two scenes, 4 pedestrians each

    out = nmpnet_forward(params, h_states, seq_start_end, end_pos)
    out = jax.block_until_ready(out)
    assert out.shape == (batch, BOTTLENECK_DIM), out.shape
    assert bool(jnp.all(jnp.isfinite(out)))
    print("KERNEL_OK")
</pallas_src>

<mosaic_0001>
module attributes {stable_mosaic.version = 11 : i64} {
  func.func @_nmpnet_kernel(%arg0: i32, %arg1: memref<2xi32, #tpu.memory_space<smem>>, %arg2: memref<1x4x32xf32, #tpu.memory_space<vmem>>, %arg3: memref<1x4x2xf32, #tpu.memory_space<vmem>>, %arg4: memref<2x32xf32, #tpu.memory_space<vmem>>, %arg5: memref<1x32xf32, #tpu.memory_space<vmem>>, %arg6: memref<96x128xbf16, #tpu.memory_space<vmem>>, %arg7: memref<1x128xf32, #tpu.memory_space<vmem>>, %arg8: memref<128x32xbf16, #tpu.memory_space<vmem>>, %arg9: memref<1x32xf32, #tpu.memory_space<vmem>>, %arg10: memref<32x128xbf16, #tpu.memory_space<vmem>>, %arg11: memref<1x128xf32, #tpu.memory_space<vmem>>, %arg12: memref<128x32xbf16, #tpu.memory_space<vmem>>, %arg13: memref<1x32xf32, #tpu.memory_space<vmem>>, %arg14: memref<64x128xbf16, #tpu.memory_space<vmem>>, %arg15: memref<1x128xf32, #tpu.memory_space<vmem>>, %arg16: memref<128x32xbf16, #tpu.memory_space<vmem>>, %arg17: memref<1x32xf32, #tpu.memory_space<vmem>>, %arg18: memref<32x128xbf16, #tpu.memory_space<vmem>>, %arg19: memref<1x128xf32, #tpu.memory_space<vmem>>, %arg20: memref<128x32xbf16, #tpu.memory_space<vmem>>, %arg21: memref<1x32xf32, #tpu.memory_space<vmem>>, %arg22: memref<64x128xbf16, #tpu.memory_space<vmem>>, %arg23: memref<1x128xf32, #tpu.memory_space<vmem>>, %arg24: memref<128x32xbf16, #tpu.memory_space<vmem>>, %arg25: memref<1x32xf32, #tpu.memory_space<vmem>>, %arg26: memref<32x128xbf16, #tpu.memory_space<vmem>>, %arg27: memref<1x128xf32, #tpu.memory_space<vmem>>, %arg28: memref<128x128xbf16, #tpu.memory_space<vmem>>, %arg29: memref<1x128xf32, #tpu.memory_space<vmem>>, %arg30: memref<1x4x128xf32, #tpu.memory_space<vmem>>) attributes {dimension_semantics = [#tpu.dimension_semantics<parallel>], iteration_bounds = array<i64: 2>, scalar_prefetch = 1 : i64, scratch_operands = 0 : i64, tpu.core_type = #tpu.core_type<tc>, window_params = [{transform_indices = @transform_0, window_bounds = array<i64: 1, 4, 32>}, {transform_indices = @transform_1, window_bounds = array<i64: 1, 4, 2>}, {pipeline_mode = #tpu.pipeline_mode<synchronous>, transform_indices = @transform_2, window_bounds = array<i64: 2, 32>}, {pipeline_mode = #tpu.pipeline_mode<synchronous>, transform_indices = @transform_3, window_bounds = array<i64: 1, 32>}, {pipeline_mode = #tpu.pipeline_mode<synchronous>, transform_indices = @transform_4, window_bounds = array<i64: 96, 128>}, {pipeline_mode = #tpu.pipeline_mode<synchronous>, transform_indices = @transform_5, window_bounds = array<i64: 1, 128>}, {pipeline_mode = #tpu.pipeline_mode<synchronous>, transform_indices = @transform_6, window_bounds = array<i64: 128, 32>}, {pipeline_mode = #tpu.pipeline_mode<synchronous>, transform_indices = @transform_7, window_bounds = array<i64: 1, 32>}, {pipeline_mode = #tpu.pipeline_mode<synchronous>, transform_indices = @transform_8, window_bounds = array<i64: 32, 128>}, {pipeline_mode = #tpu.pipeline_mode<synchronous>, transform_indices = @transform_9, window_bounds = array<i64: 1, 128>}, {pipeline_mode = #tpu.pipeline_mode<synchronous>, transform_indices = @transform_10, window_bounds = array<i64: 128, 32>}, {pipeline_mode = #tpu.pipeline_mode<synchronous>, transform_indices = @transform_11, window_bounds = array<i64: 1, 32>}, {pipeline_mode = #tpu.pipeline_mode<synchronous>, transform_indices = @transform_12, window_bounds = array<i64: 64, 128>}, {pipeline_mode = #tpu.pipeline_mode<synchronous>, transform_indices = @transform_13, window_bounds = array<i64: 1, 128>}, {pipeline_mode = #tpu.pipeline_mode<synchronous>, transform_indices = @transform_14, window_bounds = array<i64: 128, 32>}, {pipeline_mode = #tpu.pipeline_mode<synchronous>, transform_indices = @transform_15, window_bounds = array<i64: 1, 32>}, {pipeline_mode = #tpu.pipeline_mode<synchronous>, transform_indices = @transform_16, window_bounds = array<i64: 32, 128>}, {pipeline_mode = #tpu.pipeline_mode<synchronous>, transform_indices = @transform_17, window_bounds = array<i64: 1, 128>}, {pipeline_mode = #tpu.pipeline_mode<synchronous>, transform_indices = @transform_18, window_bounds = array<i64: 128, 32>}, {pipeline_mode = #tpu.pipeline_mode<synchronous>, transform_indices = @transform_19, window_bounds = array<i64: 1, 32>}, {pipeline_mode = #tpu.pipeline_mode<synchronous>, transform_indices = @transform_20, window_bounds = array<i64: 64, 128>}, {pipeline_mode = #tpu.pipeline_mode<synchronous>, transform_indices = @transform_21, window_bounds = array<i64: 1, 128>}, {pipeline_mode = #tpu.pipeline_mode<synchronous>, transform_indices = @transform_22, window_bounds = array<i64: 128, 32>}, {pipeline_mode = #tpu.pipeline_mode<synchronous>, transform_indices = @transform_23, window_bounds = array<i64: 1, 32>}, {pipeline_mode = #tpu.pipeline_mode<synchronous>, transform_indices = @transform_24, window_bounds = array<i64: 32, 128>}, {pipeline_mode = #tpu.pipeline_mode<synchronous>, transform_indices = @transform_25, window_bounds = array<i64: 1, 128>}, {pipeline_mode = #tpu.pipeline_mode<synchronous>, transform_indices = @transform_26, window_bounds = array<i64: 128, 128>}, {pipeline_mode = #tpu.pipeline_mode<synchronous>, transform_indices = @transform_27, window_bounds = array<i64: 1, 128>}, {transform_indices = @transform_28, window_bounds = array<i64: 1, 4, 128>}]} {
    %0 = arith.index_cast %arg0 : i32 to index
    %1 = memref.load %arg1[%0] : memref<2xi32, #tpu.memory_space<smem>>
    %c0 = arith.constant 0 : index
    %c0_0 = arith.constant 0 : index
    %c0_1 = arith.constant 0 : index
    %2 = vector.load %arg2[%c0, %c0_0, %c0_1] : memref<1x4x32xf32, #tpu.memory_space<vmem>>, vector<1x4x32xf32>
    %3 = vector.shape_cast %2 : vector<1x4x32xf32> to vector<4x32xf32>
    %c0_2 = arith.constant 0 : index
    %c0_3 = arith.constant 0 : index
    %c0_4 = arith.constant 0 : index
    %4 = vector.load %arg3[%c0_2, %c0_3, %c0_4] : memref<1x4x2xf32, #tpu.memory_space<vmem>>, vector<1x4x2xf32>
    %5 = vector.shape_cast %4 : vector<1x4x2xf32> to vector<4x2xf32>
    %6 = tpu.concatenate %5, %5, %5, %5 in 0 : vector<4x2xf32>, vector<4x2xf32>, vector<4x2xf32>, vector<4x2xf32> -> vector<16x2xf32>
    %7 = vector.extract_strided_slice %5 {offsets = [0, 0], sizes = [1, 2], strides = [1, 1]} : vector<4x2xf32> to vector<1x2xf32>
    %8 = vector.shape_cast %7 : vector<1x2xf32> to vector<1x2xf32>
    %9 = vector.broadcast %8 : vector<1x2xf32> to vector<4x2xf32>
    %10 = vector.extract_strided_slice %5 {offsets = [1, 0], sizes = [1, 2], strides = [1, 1]} : vector<4x2xf32> to vector<1x2xf32>
    %11 = vector.shape_cast %10 : vector<1x2xf32> to vector<1x2xf32>
    %12 = vector.broadcast %11 : vector<1x2xf32> to vector<4x2xf32>
    %13 = vector.extract_strided_slice %5 {offsets = [2, 0], sizes = [1, 2], strides = [1, 1]} : vector<4x2xf32> to vector<1x2xf32>
    %14 = vector.shape_cast %13 : vector<1x2xf32> to vector<1x2xf32>
    %15 = vector.broadcast %14 : vector<1x2xf32> to vector<4x2xf32>
    %16 = vector.extract_strided_slice %5 {offsets = [3, 0], sizes = [1, 2], strides = [1, 1]} : vector<4x2xf32> to vector<1x2xf32>
    %17 = vector.shape_cast %16 : vector<1x2xf32> to vector<1x2xf32>
    %18 = vector.broadcast %17 : vector<1x2xf32> to vector<4x2xf32>
    %19 = tpu.concatenate %9, %12, %15, %18 in 0 : vector<4x2xf32>, vector<4x2xf32>, vector<4x2xf32>, vector<4x2xf32> -> vector<16x2xf32>
    %20 = arith.subf %6, %19 : vector<16x2xf32>
    %c0_5 = arith.constant 0 : index
    %c0_6 = arith.constant 0 : index
    %21 = vector.load %arg4[%c0_5, %c0_6] : memref<2x32xf32, #tpu.memory_space<vmem>>, vector<2x32xf32>
    %c0_7 = arith.constant 0 : index
    %c0_8 = arith.constant 0 : index
    %22 = vector.load %arg5[%c0_7, %c0_8] : memref<1x32xf32, #tpu.memory_space<vmem>>, vector<1x32xf32>
    %23 = vector.extract_strided_slice %20 {offsets = [0, 0], sizes = [16, 1], strides = [1, 1]} : vector<16x2xf32> to vector<16x1xf32>
    %24 = vector.extract_strided_slice %21 {offsets = [0, 0], sizes = [1, 32], strides = [1, 1]} : vector<2x32xf32> to vector<1x32xf32>
    %25 = vector.broadcast %23 : vector<16x1xf32> to vector<16x32xf32>
    %26 = vector.broadcast %24 : vector<1x32xf32> to vector<16x32xf32>
    %27 = arith.mulf %25, %26 : vector<16x32xf32>
    %28 = vector.extract_strided_slice %20 {offsets = [0, 1], sizes = [16, 1], strides = [1, 1]} : vector<16x2xf32> to vector<16x1xf32>
    %29 = vector.extract_strided_slice %21 {offsets = [1, 0], sizes = [1, 32], strides = [1, 1]} : vector<2x32xf32> to vector<1x32xf32>
    %30 = vector.broadcast %28 : vector<16x1xf32> to vector<16x32xf32>
    %31 = vector.broadcast %29 : vector<1x32xf32> to vector<16x32xf32>
    %32 = arith.mulf %30, %31 : vector<16x32xf32>
    %33 = arith.addf %27, %32 : vector<16x32xf32>
    %34 = vector.broadcast %22 : vector<1x32xf32> to vector<16x32xf32>
    %35 = arith.addf %33, %34 : vector<16x32xf32>
    %36 = tpu.concatenate %3, %3, %3, %3 in 0 : vector<4x32xf32>, vector<4x32xf32>, vector<4x32xf32>, vector<4x32xf32> -> vector<16x32xf32>
    %37 = vector.extract_strided_slice %3 {offsets = [0, 0], sizes = [1, 32], strides = [1, 1]} : vector<4x32xf32> to vector<1x32xf32>
    %38 = vector.shape_cast %37 : vector<1x32xf32> to vector<1x32xf32>
    %39 = vector.broadcast %38 : vector<1x32xf32> to vector<4x32xf32>
    %40 = vector.extract_strided_slice %3 {offsets = [1, 0], sizes = [1, 32], strides = [1, 1]} : vector<4x32xf32> to vector<1x32xf32>
    %41 = vector.shape_cast %40 : vector<1x32xf32> to vector<1x32xf32>
    %42 = vector.broadcast %41 : vector<1x32xf32> to vector<4x32xf32>
    %43 = vector.extract_strided_slice %3 {offsets = [2, 0], sizes = [1, 32], strides = [1, 1]} : vector<4x32xf32> to vector<1x32xf32>
    %44 = vector.shape_cast %43 : vector<1x32xf32> to vector<1x32xf32>
    %45 = vector.broadcast %44 : vector<1x32xf32> to vector<4x32xf32>
    %46 = vector.extract_strided_slice %3 {offsets = [3, 0], sizes = [1, 32], strides = [1, 1]} : vector<4x32xf32> to vector<1x32xf32>
    %47 = vector.shape_cast %46 : vector<1x32xf32> to vector<1x32xf32>
    %48 = vector.broadcast %47 : vector<1x32xf32> to vector<4x32xf32>
    %49 = tpu.concatenate %39, %42, %45, %48 in 0 : vector<4x32xf32>, vector<4x32xf32>, vector<4x32xf32>, vector<4x32xf32> -> vector<16x32xf32>
    %50 = tpu.concatenate %36, %49 in 1 : vector<16x32xf32>, vector<16x32xf32> -> vector<16x64xf32>
    %51 = tpu.concatenate %50, %35 in 1 : vector<16x64xf32>, vector<16x32xf32> -> vector<16x96xf32>
    %52 = arith.truncf %51 : vector<16x96xf32> to vector<16x96xbf16>
    %c0_9 = arith.constant 0 : index
    %c0_10 = arith.constant 0 : index
    %53 = vector.load %arg6[%c0_9, %c0_10] : memref<96x128xbf16, #tpu.memory_space<vmem>>, vector<96x128xbf16>
    %cst = arith.constant dense<0.000000e+00> : vector<16x128xf32>
    %54 = tpu.matmul %52, %53, %cst {dimension_numbers = #tpu.dot_dimension_numbers<[1], [0], [0], [1], [0, 0, 1, 1], [], []>} : vector<16x96xbf16>, vector<96x128xbf16>, vector<16x128xf32> -> vector<16x128xf32>
    %c0_11 = arith.constant 0 : index
    %c0_12 = arith.constant 0 : index
    %55 = vector.load %arg7[%c0_11, %c0_12] : memref<1x128xf32, #tpu.memory_space<vmem>>, vector<1x128xf32>
    %56 = vector.broadcast %55 : vector<1x128xf32> to vector<16x128xf32>
    %57 = arith.addf %54, %56 : vector<16x128xf32>
    %58 = arith.truncf %57 : vector<16x128xf32> to vector<16x128xbf16>
    %c0_13 = arith.constant 0 : index
    %c0_14 = arith.constant 0 : index
    %59 = vector.load %arg8[%c0_13, %c0_14] : memref<128x32xbf16, #tpu.memory_space<vmem>>, vector<128x32xbf16>
    %cst_15 = arith.constant dense<0.000000e+00> : vector<16x32xf32>
    %60 = tpu.matmul %58, %59, %cst_15 {dimension_numbers = #tpu.dot_dimension_numbers<[1], [0], [0], [1], [0, 0, 1, 1], [], []>} : vector<16x128xbf16>, vector<128x32xbf16>, vector<16x32xf32> -> vector<16x32xf32>
    %c0_16 = arith.constant 0 : index
    %c0_17 = arith.constant 0 : index
    %61 = vector.load %arg9[%c0_16, %c0_17] : memref<1x32xf32, #tpu.memory_space<vmem>>, vector<1x32xf32>
    %62 = vector.broadcast %61 : vector<1x32xf32> to vector<16x32xf32>
    %63 = arith.addf %60, %62 : vector<16x32xf32>
    %cst_18 = arith.constant 0.000000e+00 : f32
    %64 = vector.broadcast %cst_18 : f32 to vector<4x32xf32>
    %c0_i32 = arith.constant 0 : i32
    %65 = arith.cmpi sgt, %1, %c0_i32 : i32
    %66 = arith.extui %65 : i1 to i32
    %67 = arith.sitofp %66 : i32 to f32
    %68 = vector.extract_strided_slice %63 {offsets = [0, 0], sizes = [4, 32], strides = [1, 1]} : vector<16x32xf32> to vector<4x32xf32>
    %69 = vector.broadcast %67 : f32 to vector<4x32xf32>
    %70 = arith.mulf %68, %69 : vector<4x32xf32>
    %71 = arith.addf %64, %70 : vector<4x32xf32>
    %c1_i32 = arith.constant 1 : i32
    %72 = arith.cmpi sgt, %1, %c1_i32 : i32
    %73 = arith.extui %72 : i1 to i32
    %74 = arith.sitofp %73 : i32 to f32
    %75 = vector.extract_strided_slice %63 {offsets = [4, 0], sizes = [4, 32], strides = [1, 1]} : vector<16x32xf32> to vector<4x32xf32>
    %76 = vector.broadcast %74 : f32 to vector<4x32xf32>
    %77 = arith.mulf %75, %76 : vector<4x32xf32>
    %78 = arith.addf %71, %77 : vector<4x32xf32>
    %c2_i32 = arith.constant 2 : i32
    %79 = arith.cmpi sgt, %1, %c2_i32 : i32
    %80 = arith.extui %79 : i1 to i32
    %81 = arith.sitofp %80 : i32 to f32
    %82 = vector.extract_strided_slice %63 {offsets = [8, 0], sizes = [4, 32], strides = [1, 1]} : vector<16x32xf32> to vector<4x32xf32>
    %83 = vector.broadcast %81 : f32 to vector<4x32xf32>
    %84 = arith.mulf %82, %83 : vector<4x32xf32>
    %85 = arith.addf %78, %84 : vector<4x32xf32>
    %c3_i32 = arith.constant 3 : i32
    %86 = arith.cmpi sgt, %1, %c3_i32 : i32
    %87 = arith.extui %86 : i1 to i32
    %88 = arith.sitofp %87 : i32 to f32
    %89 = vector.extract_strided_slice %63 {offsets = [12, 0], sizes = [4, 32], strides = [1, 1]} : vector<16x32xf32> to vector<4x32xf32>
    %90 = vector.broadcast %88 : f32 to vector<4x32xf32>
    %91 = arith.mulf %89, %90 : vector<4x32xf32>
    %92 = arith.addf %85, %91 : vector<4x32xf32>
    %cst_19 = arith.constant 3.125000e-02 : f32
    %93 = vector.broadcast %cst_19 : f32 to vector<4x32xf32>
    %94 = arith.mulf %92, %93 : vector<4x32xf32>
    %95 = arith.truncf %94 : vector<4x32xf32> to vector<4x32xbf16>
    %c0_20 = arith.constant 0 : index
    %c0_21 = arith.constant 0 : index
    %96 = vector.load %arg10[%c0_20, %c0_21] : memref<32x128xbf16, #tpu.memory_space<vmem>>, vector<32x128xbf16>
    %cst_22 = arith.constant dense<0.000000e+00> : vector<4x128xf32>
    %97 = tpu.matmul %95, %96, %cst_22 {dimension_numbers = #tpu.dot_dimension_numbers<[1], [0], [0], [1], [0, 0, 1, 1], [], []>} : vector<4x32xbf16>, vector<32x128xbf16>, vector<4x128xf32> -> vector<4x128xf32>
    %c0_23 = arith.constant 0 : index
    %c0_24 = arith.constant 0 : index
    %98 = vector.load %arg11[%c0_23, %c0_24] : memref<1x128xf32, #tpu.memory_space<vmem>>, vector<1x128xf32>
    %99 = vector.broadcast %98 : vector<1x128xf32> to vector<4x128xf32>
    %100 = arith.addf %97, %99 : vector<4x128xf32>
    %101 = arith.truncf %100 : vector<4x128xf32> to vector<4x128xbf16>
    %c0_25 = arith.constant 0 : index
    %c0_26 = arith.constant 0 : index
    %102 = vector.load %arg12[%c0_25, %c0_26] : memref<128x32xbf16, #tpu.memory_space<vmem>>, vector<128x32xbf16>
    %cst_27 = arith.constant dense<0.000000e+00> : vector<4x32xf32>
    %103 = tpu.matmul %101, %102, %cst_27 {dimension_numbers = #tpu.dot_dimension_numbers<[1], [0], [0], [1], [0, 0, 1, 1], [], []>} : vector<4x128xbf16>, vector<128x32xbf16>, vector<4x32xf32> -> vector<4x32xf32>
    %c0_28 = arith.constant 0 : index
    %c0_29 = arith.constant 0 : index
    %104 = vector.load %arg13[%c0_28, %c0_29] : memref<1x32xf32, #tpu.memory_space<vmem>>, vector<1x32xf32>
    %105 = vector.broadcast %104 : vector<1x32xf32> to vector<4x32xf32>
    %106 = arith.addf %103, %105 : vector<4x32xf32>
    %107 = tpu.concatenate %106, %106, %106, %106 in 0 : vector<4x32xf32>, vector<4x32xf32>, vector<4x32xf32>, vector<4x32xf32> -> vector<16x32xf32>
    %108 = vector.extract_strided_slice %106 {offsets = [0, 0], sizes = [1, 32], strides = [1, 1]} : vector<4x32xf32> to vector<1x32xf32>
    %109 = vector.shape_cast %108 : vector<1x32xf32> to vector<1x32xf32>
    %110 = vector.broadcast %109 : vector<1x32xf32> to vector<4x32xf32>
    %111 = vector.extract_strided_slice %106 {offsets = [1, 0], sizes = [1, 32], strides = [1, 1]} : vector<4x32xf32> to vector<1x32xf32>
    %112 = vector.shape_cast %111 : vector<1x32xf32> to vector<1x32xf32>
    %113 = vector.broadcast %112 : vector<1x32xf32> to vector<4x32xf32>
    %114 = vector.extract_strided_slice %106 {offsets = [2, 0], sizes = [1, 32], strides = [1, 1]} : vector<4x32xf32> to vector<1x32xf32>
    %115 = vector.shape_cast %114 : vector<1x32xf32> to vector<1x32xf32>
    %116 = vector.broadcast %115 : vector<1x32xf32> to vector<4x32xf32>
    %117 = vector.extract_strided_slice %106 {offsets = [3, 0], sizes = [1, 32], strides = [1, 1]} : vector<4x32xf32> to vector<1x32xf32>
    %118 = vector.shape_cast %117 : vector<1x32xf32> to vector<1x32xf32>
    %119 = vector.broadcast %118 : vector<1x32xf32> to vector<4x32xf32>
    %120 = tpu.concatenate %110, %113, %116, %119 in 0 : vector<4x32xf32>, vector<4x32xf32>, vector<4x32xf32>, vector<4x32xf32> -> vector<16x32xf32>
    %121 = tpu.concatenate %107, %120 in 1 : vector<16x32xf32>, vector<16x32xf32> -> vector<16x64xf32>
    %122 = arith.truncf %121 : vector<16x64xf32> to vector<16x64xbf16>
    %c0_30 = arith.constant 0 : index
    %c0_31 = arith.constant 0 : index
    %123 = vector.load %arg14[%c0_30, %c0_31] : memref<64x128xbf16, #tpu.memory_space<vmem>>, vector<64x128xbf16>
    %cst_32 = arith.constant dense<0.000000e+00> : vector<16x128xf32>
    %124 = tpu.matmul %122, %123, %cst_32 {dimension_numbers = #tpu.dot_dimension_numbers<[1], [0], [0], [1], [0, 0, 1, 1], [], []>} : vector<16x64xbf16>, vector<64x128xbf16>, vector<16x128xf32> -> vector<16x128xf32>
    %c0_33 = arith.constant 0 : index
    %c0_34 = arith.constant 0 : index
    %125 = vector.load %arg15[%c0_33, %c0_34] : memref<1x128xf32, #tpu.memory_space<vmem>>, vector<1x128xf32>
    %126 = vector.broadcast %125 : vector<1x128xf32> to vector<16x128xf32>
    %127 = arith.addf %124, %126 : vector<16x128xf32>
    %128 = arith.truncf %127 : vector<16x128xf32> to vector<16x128xbf16>
    %c0_35 = arith.constant 0 : index
    %c0_36 = arith.constant 0 : index
    %129 = vector.load %arg16[%c0_35, %c0_36] : memref<128x32xbf16, #tpu.memory_space<vmem>>, vector<128x32xbf16>
    %cst_37 = arith.constant dense<0.000000e+00> : vector<16x32xf32>
    %130 = tpu.matmul %128, %129, %cst_37 {dimension_numbers = #tpu.dot_dimension_numbers<[1], [0], [0], [1], [0, 0, 1, 1], [], []>} : vector<16x128xbf16>, vector<128x32xbf16>, vector<16x32xf32> -> vector<16x32xf32>
    %c0_38 = arith.constant 0 : index
    %c0_39 = arith.constant 0 : index
    %131 = vector.load %arg17[%c0_38, %c0_39] : memref<1x32xf32, #tpu.memory_space<vmem>>, vector<1x32xf32>
    %132 = vector.broadcast %131 : vector<1x32xf32> to vector<16x32xf32>
    %133 = arith.addf %130, %132 : vector<16x32xf32>
    %cst_40 = arith.constant 0.000000e+00 : f32
    %134 = vector.broadcast %cst_40 : f32 to vector<4x32xf32>
    %c0_i32_41 = arith.constant 0 : i32
    %135 = arith.cmpi sgt, %1, %c0_i32_41 : i32
    %136 = arith.extui %135 : i1 to i32
    %137 = arith.sitofp %136 : i32 to f32
    %138 = vector.extract_strided_slice %133 {offsets = [0, 0], sizes = [4, 32], strides = [1, 1]} : vector<16x32xf32> to vector<4x32xf32>
    %139 = vector.broadcast %137 : f32 to vector<4x32xf32>
    %140 = arith.mulf %138, %139 : vector<4x32xf32>
    %141 = arith.addf %134, %140 : vector<4x32xf32>
    %c1_i32_42 = arith.constant 1 : i32
    %142 = arith.cmpi sgt, %1, %c1_i32_42 : i32
    %143 = arith.extui %142 : i1 to i32
    %144 = arith.sitofp %143 : i32 to f32
    %145 = vector.extract_strided_slice %133 {offsets = [4, 0], sizes = [4, 32], strides = [1, 1]} : vector<16x32xf32> to vector<4x32xf32>
    %146 = vector.broadcast %144 : f32 to vector<4x32xf32>
    %147 = arith.mulf %145, %146 : vector<4x32xf32>
    %148 = arith.addf %141, %147 : vector<4x32xf32>
    %c2_i32_43 = arith.constant 2 : i32
    %149 = arith.cmpi sgt, %1, %c2_i32_43 : i32
    %150 = arith.extui %149 : i1 to i32
    %151 = arith.sitofp %150 : i32 to f32
    %152 = vector.extract_strided_slice %133 {offsets = [8, 0], sizes = [4, 32], strides = [1, 1]} : vector<16x32xf32> to vector<4x32xf32>
    %153 = vector.broadcast %151 : f32 to vector<4x32xf32>
    %154 = arith.mulf %152, %153 : vector<4x32xf32>
    %155 = arith.addf %148, %154 : vector<4x32xf32>
    %c3_i32_44 = arith.constant 3 : i32
    %156 = arith.cmpi sgt, %1, %c3_i32_44 : i32
    %157 = arith.extui %156 : i1 to i32
    %158 = arith.sitofp %157 : i32 to f32
    %159 = vector.extract_strided_slice %133 {offsets = [12, 0], sizes = [4, 32], strides = [1, 1]} : vector<16x32xf32> to vector<4x32xf32>
    %160 = vector.broadcast %158 : f32 to vector<4x32xf32>
    %161 = arith.mulf %159, %160 : vector<4x32xf32>
    %162 = arith.addf %155, %161 : vector<4x32xf32>
    %cst_45 = arith.constant 3.125000e-02 : f32
    %163 = vector.broadcast %cst_45 : f32 to vector<4x32xf32>
    %164 = arith.mulf %162, %163 : vector<4x32xf32>
    %165 = arith.truncf %164 : vector<4x32xf32> to vector<4x32xbf16>
    %c0_46 = arith.constant 0 : index
    %c0_47 = arith.constant 0 : index
    %166 = vector.load %arg18[%c0_46, %c0_47] : memref<32x128xbf16, #tpu.memory_space<vmem>>, vector<32x128xbf16>
    %cst_48 = arith.constant dense<0.000000e+00> : vector<4x128xf32>
    %167 = tpu.matmul %165, %166, %cst_48 {dimension_numbers = #tpu.dot_dimension_numbers<[1], [0], [0], [1], [0, 0, 1, 1], [], []>} : vector<4x32xbf16>, vector<32x128xbf16>, vector<4x128xf32> -> vector<4x128xf32>
    %c0_49 = arith.constant 0 : index
    %c0_50 = arith.constant 0 : index
    %168 = vector.load %arg19[%c0_49, %c0_50] : memref<1x128xf32, #tpu.memory_space<vmem>>, vector<1x128xf32>
    %169 = vector.broadcast %168 : vector<1x128xf32> to vector<4x128xf32>
    %170 = arith.addf %167, %169 : vector<4x128xf32>
    %171 = arith.truncf %170 : vector<4x128xf32> to vector<4x128xbf16>
    %c0_51 = arith.constant 0 : index
    %c0_52 = arith.constant 0 : index
    %172 = vector.load %arg20[%c0_51, %c0_52] : memref<128x32xbf16, #tpu.memory_space<vmem>>, vector<128x32xbf16>
    %cst_53 = arith.constant dense<0.000000e+00> : vector<4x32xf32>
    %173 = tpu.matmul %171, %172, %cst_53 {dimension_numbers = #tpu.dot_dimension_numbers<[1], [0], [0], [1], [0, 0, 1, 1], [], []>} : vector<4x128xbf16>, vector<128x32xbf16>, vector<4x32xf32> -> vector<4x32xf32>
    %c0_54 = arith.constant 0 : index
    %c0_55 = arith.constant 0 : index
    %174 = vector.load %arg21[%c0_54, %c0_55] : memref<1x32xf32, #tpu.memory_space<vmem>>, vector<1x32xf32>
    %175 = vector.broadcast %174 : vector<1x32xf32> to vector<4x32xf32>
    %176 = arith.addf %173, %175 : vector<4x32xf32>
    %177 = tpu.concatenate %176, %176, %176, %176 in 0 : vector<4x32xf32>, vector<4x32xf32>, vector<4x32xf32>, vector<4x32xf32> -> vector<16x32xf32>
    %178 = vector.extract_strided_slice %176 {offsets = [0, 0], sizes = [1, 32], strides = [1, 1]} : vector<4x32xf32> to vector<1x32xf32>
    %179 = vector.shape_cast %178 : vector<1x32xf32> to vector<1x32xf32>
    %180 = vector.broadcast %179 : vector<1x32xf32> to vector<4x32xf32>
    %181 = vector.extract_strided_slice %176 {offsets = [1, 0], sizes = [1, 32], strides = [1, 1]} : vector<4x32xf32> to vector<1x32xf32>
    %182 = vector.shape_cast %181 : vector<1x32xf32> to vector<1x32xf32>
    %183 = vector.broadcast %182 : vector<1x32xf32> to vector<4x32xf32>
    %184 = vector.extract_strided_slice %176 {offsets = [2, 0], sizes = [1, 32], strides = [1, 1]} : vector<4x32xf32> to vector<1x32xf32>
    %185 = vector.shape_cast %184 : vector<1x32xf32> to vector<1x32xf32>
    %186 = vector.broadcast %185 : vector<1x32xf32> to vector<4x32xf32>
    %187 = vector.extract_strided_slice %176 {offsets = [3, 0], sizes = [1, 32], strides = [1, 1]} : vector<4x32xf32> to vector<1x32xf32>
    %188 = vector.shape_cast %187 : vector<1x32xf32> to vector<1x32xf32>
    %189 = vector.broadcast %188 : vector<1x32xf32> to vector<4x32xf32>
    %190 = tpu.concatenate %180, %183, %186, %189 in 0 : vector<4x32xf32>, vector<4x32xf32>, vector<4x32xf32>, vector<4x32xf32> -> vector<16x32xf32>
    %191 = tpu.concatenate %177, %190 in 1 : vector<16x32xf32>, vector<16x32xf32> -> vector<16x64xf32>
    %192 = arith.truncf %191 : vector<16x64xf32> to vector<16x64xbf16>
    %c0_56 = arith.constant 0 : index
    %c0_57 = arith.constant 0 : index
    %193 = vector.load %arg22[%c0_56, %c0_57] : memref<64x128xbf16, #tpu.memory_space<vmem>>, vector<64x128xbf16>
    %cst_58 = arith.constant dense<0.000000e+00> : vector<16x128xf32>
    %194 = tpu.matmul %192, %193, %cst_58 {dimension_numbers = #tpu.dot_dimension_numbers<[1], [0], [0], [1], [0, 0, 1, 1], [], []>} : vector<16x64xbf16>, vector<64x128xbf16>, vector<16x128xf32> -> vector<16x128xf32>
    %c0_59 = arith.constant 0 : index
    %c0_60 = arith.constant 0 : index
    %195 = vector.load %arg23[%c0_59, %c0_60] : memref<1x128xf32, #tpu.memory_space<vmem>>, vector<1x128xf32>
    %196 = vector.broadcast %195 : vector<1x128xf32> to vector<16x128xf32>
    %197 = arith.addf %194, %196 : vector<16x128xf32>
    %198 = arith.truncf %197 : vector<16x128xf32> to vector<16x128xbf16>
    %c0_61 = arith.constant 0 : index
    %c0_62 = arith.constant 0 : index
    %199 = vector.load %arg24[%c0_61, %c0_62] : memref<128x32xbf16, #tpu.memory_space<vmem>>, vector<128x32xbf16>
    %cst_63 = arith.constant dense<0.000000e+00> : vector<16x32xf32>
    %200 = tpu.matmul %198, %199, %cst_63 {dimension_numbers = #tpu.dot_dimension_numbers<[1], [0], [0], [1], [0, 0, 1, 1], [], []>} : vector<16x128xbf16>, vector<128x32xbf16>, vector<16x32xf32> -> vector<16x32xf32>
    %c0_64 = arith.constant 0 : index
    %c0_65 = arith.constant 0 : index
    %201 = vector.load %arg25[%c0_64, %c0_65] : memref<1x32xf32, #tpu.memory_space<vmem>>, vector<1x32xf32>
    %202 = vector.broadcast %201 : vector<1x32xf32> to vector<16x32xf32>
    %203 = arith.addf %200, %202 : vector<16x32xf32>
    %cst_66 = arith.constant 0.000000e+00 : f32
    %204 = vector.broadcast %cst_66 : f32 to vector<4x32xf32>
    %c0_i32_67 = arith.constant 0 : i32
    %205 = arith.cmpi sgt, %1, %c0_i32_67 : i32
    %206 = arith.extui %205 : i1 to i32
    %207 = arith.sitofp %206 : i32 to f32
    %208 = vector.extract_strided_slice %203 {offsets = [0, 0], sizes = [4, 32], strides = [1, 1]} : vector<16x32xf32> to vector<4x32xf32>
    %209 = vector.broadcast %207 : f32 to vector<4x32xf32>
    %210 = arith.mulf %208, %209 : vector<4x32xf32>
    %211 = arith.addf %204, %210 : vector<4x32xf32>
    %c1_i32_68 = arith.constant 1 : i32
    %212 = arith.cmpi sgt, %1, %c1_i32_68 : i32
    %213 = arith.extui %212 : i1 to i32
    %214 = arith.sitofp %213 : i32 to f32
    %215 = vector.extract_strided_slice %203 {offsets = [4, 0], sizes = [4, 32], strides = [1, 1]} : vector<16x32xf32> to vector<4x32xf32>
    %216 = vector.broadcast %214 : f32 to vector<4x32xf32>
    %217 = arith.mulf %215, %216 : vector<4x32xf32>
    %218 = arith.addf %211, %217 : vector<4x32xf32>
    %c2_i32_69 = arith.constant 2 : i32
    %219 = arith.cmpi sgt, %1, %c2_i32_69 : i32
    %220 = arith.extui %219 : i1 to i32
    %221 = arith.sitofp %220 : i32 to f32
    %222 = vector.extract_strided_slice %203 {offsets = [8, 0], sizes = [4, 32], strides = [1, 1]} : vector<16x32xf32> to vector<4x32xf32>
    %223 = vector.broadcast %221 : f32 to vector<4x32xf32>
    %224 = arith.mulf %222, %223 : vector<4x32xf32>
    %225 = arith.addf %218, %224 : vector<4x32xf32>
    %c3_i32_70 = arith.constant 3 : i32
    %226 = arith.cmpi sgt, %1, %c3_i32_70 : i32
    %227 = arith.extui %226 : i1 to i32
    %228 = arith.sitofp %227 : i32 to f32
    %229 = vector.extract_strided_slice %203 {offsets = [12, 0], sizes = [4, 32], strides = [1, 1]} : vector<16x32xf32> to vector<4x32xf32>
    %230 = vector.broadcast %228 : f32 to vector<4x32xf32>
    %231 = arith.mulf %229, %230 : vector<4x32xf32>
    %232 = arith.addf %225, %231 : vector<4x32xf32>
    %cst_71 = arith.constant 3.125000e-02 : f32
    %233 = vector.broadcast %cst_71 : f32 to vector<4x32xf32>
    %234 = arith.mulf %232, %233 : vector<4x32xf32>
    %235 = arith.truncf %234 : vector<4x32xf32> to vector<4x32xbf16>
    %c0_72 = arith.constant 0 : index
    %c0_73 = arith.constant 0 : index
    %236 = vector.load %arg26[%c0_72, %c0_73] : memref<32x128xbf16, #tpu.memory_space<vmem>>, vector<32x128xbf16>
    %cst_74 = arith.constant dense<0.000000e+00> : vector<4x128xf32>
    %237 = tpu.matmul %235, %236, %cst_74 {dimension_numbers = #tpu.dot_dimension_numbers<[1], [0], [0], [1], [0, 0, 1, 1], [], []>} : vector<4x32xbf16>, vector<32x128xbf16>, vector<4x128xf32> -> vector<4x128xf32>
    %c0_75 = arith.constant 0 : index
    %c0_76 = arith.constant 0 : index
    %238 = vector.load %arg27[%c0_75, %c0_76] : memref<1x128xf32, #tpu.memory_space<vmem>>, vector<1x128xf32>
    %239 = vector.broadcast %238 : vector<1x128xf32> to vector<4x128xf32>
    %240 = arith.addf %237, %239 : vector<4x128xf32>
    %cst_77 = arith.constant 0.000000e+00 : f32
    %241 = vector.broadcast %cst_77 : f32 to vector<4x128xf32>
    %242 = arith.maximumf %240, %241 : vector<4x128xf32>
    %243 = arith.truncf %242 : vector<4x128xf32> to vector<4x128xbf16>
    %c0_78 = arith.constant 0 : index
    %c0_79 = arith.constant 0 : index
    %244 = vector.load %arg28[%c0_78, %c0_79] : memref<128x128xbf16, #tpu.memory_space<vmem>>, vector<128x128xbf16>
    %cst_80 = arith.constant dense<0.000000e+00> : vector<4x128xf32>
    %245 = tpu.matmul %243, %244, %cst_80 {dimension_numbers = #tpu.dot_dimension_numbers<[1], [0], [0], [1], [0, 0, 1, 1], [], []>} : vector<4x128xbf16>, vector<128x128xbf16>, vector<4x128xf32> -> vector<4x128xf32>
    %c0_81 = arith.constant 0 : index
    %c0_82 = arith.constant 0 : index
    %246 = vector.load %arg29[%c0_81, %c0_82] : memref<1x128xf32, #tpu.memory_space<vmem>>, vector<1x128xf32>
    %247 = vector.broadcast %246 : vector<1x128xf32> to vector<4x128xf32>
    %248 = arith.addf %245, %247 : vector<4x128xf32>
    %cst_83 = arith.constant 0.000000e+00 : f32
    %249 = vector.broadcast %cst_83 : f32 to vector<4x128xf32>
    %250 = arith.maximumf %248, %249 : vector<4x128xf32>
    %c0_84 = arith.constant 0 : index
    %c0_85 = arith.constant 0 : index
    %c0_86 = arith.constant 0 : index
    %251 = vector.load %arg30[%c0_84, %c0_85, %c0_86] : memref<1x4x128xf32, #tpu.memory_space<vmem>>, vector<1x4x128xf32>
    %252 = vector.shape_cast %251 : vector<1x4x128xf32> to vector<4x128xf32>
    %253 = vector.shape_cast %250 : vector<4x128xf32> to vector<1x4x128xf32>
    tpu.vector_store %arg30[%c0_84, %c0_85, %c0_86], %253 {strides = array<i32>} : memref<1x4x128xf32, #tpu.memory_space<vmem>>, vector<1x4x128xf32>,
    return
  }
  func.func @transform_0(%arg0: i32, %arg1: memref<2xi32, #tpu.memory_space<smem>>) -> (i32, i32, i32) {
    %c0_i32 = arith.constant 0 : i32
    %c0_i32_0 = arith.constant 0 : i32
    %c0_i32_1 = arith.constant 0 : i32
    return %arg0, %c0_i32, %c0_i32_0 : i32, i32, i32
  }
  func.func @transform_1(%arg0: i32, %arg1: memref<2xi32, #tpu.memory_space<smem>>) -> (i32, i32, i32) {
    %c0_i32 = arith.constant 0 : i32
    %c0_i32_0 = arith.constant 0 : i32
    %c0_i32_1 = arith.constant 0 : i32
    return %arg0, %c0_i32, %c0_i32_0 : i32, i32, i32
  }
  func.func @transform_2(%arg0: i32, %arg1: memref<2xi32, #tpu.memory_space<smem>>) -> (i32, i32) {
    %c0_i32 = arith.constant 0 : i32
    %c0_i32_0 = arith.constant 0 : i32
    %c0_i32_1 = arith.constant 0 : i32
    return %c0_i32, %c0_i32_0 : i32, i32
  }
  func.func @transform_3(%arg0: i32, %arg1: memref<2xi32, #tpu.memory_space<smem>>) -> (i32, i32) {
    %c0_i32 = arith.constant 0 : i32
    %c0_i32_0 = arith.constant 0 : i32
    %c0_i32_1 = arith.constant 0 : i32
    return %c0_i32, %c0_i32_0 : i32, i32
  }
  func.func @transform_4(%arg0: i32, %arg1: memref<2xi32, #tpu.memory_space<smem>>) -> (i32, i32) {
    %c0_i32 = arith.constant 0 : i32
    %c0_i32_0 = arith.constant 0 : i32
    %c0_i32_1 = arith.constant 0 : i32
    return %c0_i32, %c0_i32_0 : i32, i32
  }
  func.func @transform_5(%arg0: i32, %arg1: memref<2xi32, #tpu.memory_space<smem>>) -> (i32, i32) {
    %c0_i32 = arith.constant 0 : i32
    %c0_i32_0 = arith.constant 0 : i32
    %c0_i32_1 = arith.constant 0 : i32
    return %c0_i32, %c0_i32_0 : i32, i32
  }
  func.func @transform_6(%arg0: i32, %arg1: memref<2xi32, #tpu.memory_space<smem>>) -> (i32, i32) {
    %c0_i32 = arith.constant 0 : i32
    %c0_i32_0 = arith.constant 0 : i32
    %c0_i32_1 = arith.constant 0 : i32
    return %c0_i32, %c0_i32_0 : i32, i32
  }
  func.func @transform_7(%arg0: i32, %arg1: memref<2xi32, #tpu.memory_space<smem>>) -> (i32, i32) {
    %c0_i32 = arith.constant 0 : i32
    %c0_i32_0 = arith.constant 0 : i32
    %c0_i32_1 = arith.constant 0 : i32
    return %c0_i32, %c0_i32_0 : i32, i32
  }
  func.func @transform_8(%arg0: i32, %arg1: memref<2xi32, #tpu.memory_space<smem>>) -> (i32, i32) {
    %c0_i32 = arith.constant 0 : i32
    %c0_i32_0 = arith.constant 0 : i32
    %c0_i32_1 = arith.constant 0 : i32
    return %c0_i32, %c0_i32_0 : i32, i32
  }
  func.func @transform_9(%arg0: i32, %arg1: memref<2xi32, #tpu.memory_space<smem>>) -> (i32, i32) {
    %c0_i32 = arith.constant 0 : i32
    %c0_i32_0 = arith.constant 0 : i32
    %c0_i32_1 = arith.constant 0 : i32
    return %c0_i32, %c0_i32_0 : i32, i32
  }
  func.func @transform_10(%arg0: i32, %arg1: memref<2xi32, #tpu.memory_space<smem>>) -> (i32, i32) {
    %c0_i32 = arith.constant 0 : i32
    %c0_i32_0 = arith.constant 0 : i32
    %c0_i32_1 = arith.constant 0 : i32
    return %c0_i32, %c0_i32_0 : i32, i32
  }
  func.func @transform_11(%arg0: i32, %arg1: memref<2xi32, #tpu.memory_space<smem>>) -> (i32, i32) {
    %c0_i32 = arith.constant 0 : i32
    %c0_i32_0 = arith.constant 0 : i32
    %c0_i32_1 = arith.constant 0 : i32
    return %c0_i32, %c0_i32_0 : i32, i32
  }
  func.func @transform_12(%arg0: i32, %arg1: memref<2xi32, #tpu.memory_space<smem>>) -> (i32, i32) {
    %c0_i32 = arith.constant 0 : i32
    %c0_i32_0 = arith.constant 0 : i32
    %c0_i32_1 = arith.constant 0 : i32
    return %c0_i32, %c0_i32_0 : i32, i32
  }
  func.func @transform_13(%arg0: i32, %arg1: memref<2xi32, #tpu.memory_space<smem>>) -> (i32, i32) {
    %c0_i32 = arith.constant 0 : i32
    %c0_i32_0 = arith.constant 0 : i32
    %c0_i32_1 = arith.constant 0 : i32
    return %c0_i32, %c0_i32_0 : i32, i32
  }
  func.func @transform_14(%arg0: i32, %arg1: memref<2xi32, #tpu.memory_space<smem>>) -> (i32, i32) {
    %c0_i32 = arith.constant 0 : i32
    %c0_i32_0 = arith.constant 0 : i32
    %c0_i32_1 = arith.constant 0 : i32
    return %c0_i32, %c0_i32_0 : i32, i32
  }
  func.func @transform_15(%arg0: i32, %arg1: memref<2xi32, #tpu.memory_space<smem>>) -> (i32, i32) {
    %c0_i32 = arith.constant 0 : i32
    %c0_i32_0 = arith.constant 0 : i32
    %c0_i32_1 = arith.constant 0 : i32
    return %c0_i32, %c0_i32_0 : i32, i32
  }
  func.func @transform_16(%arg0: i32, %arg1: memref<2xi32, #tpu.memory_space<smem>>) -> (i32, i32) {
    %c0_i32 = arith.constant 0 : i32
    %c0_i32_0 = arith.constant 0 : i32
    %c0_i32_1 = arith.constant 0 : i32
    return %c0_i32, %c0_i32_0 : i32, i32
  }
  func.func @transform_17(%arg0: i32, %arg1: memref<2xi32, #tpu.memory_space<smem>>) -> (i32, i32) {
    %c0_i32 = arith.constant 0 : i32
    %c0_i32_0 = arith.constant 0 : i32
    %c0_i32_1 = arith.constant 0 : i32
    return %c0_i32, %c0_i32_0 : i32, i32
  }
  func.func @transform_18(%arg0: i32, %arg1: memref<2xi32, #tpu.memory_space<smem>>) -> (i32, i32) {
    %c0_i32 = arith.constant 0 : i32
    %c0_i32_0 = arith.constant 0 : i32
    %c0_i32_1 = arith.constant 0 : i32
    return %c0_i32, %c0_i32_0 : i32, i32
  }
  func.func @transform_19(%arg0: i32, %arg1: memref<2xi32, #tpu.memory_space<smem>>) -> (i32, i32) {
    %c0_i32 = arith.constant 0 : i32
    %c0_i32_0 = arith.constant 0 : i32
    %c0_i32_1 = arith.constant 0 : i32
    return %c0_i32, %c0_i32_0 : i32, i32
  }
  func.func @transform_20(%arg0: i32, %arg1: memref<2xi32, #tpu.memory_space<smem>>) -> (i32, i32) {
    %c0_i32 = arith.constant 0 : i32
    %c0_i32_0 = arith.constant 0 : i32
    %c0_i32_1 = arith.constant 0 : i32
    return %c0_i32, %c0_i32_0 : i32, i32
  }
  func.func @transform_21(%arg0: i32, %arg1: memref<2xi32, #tpu.memory_space<smem>>) -> (i32, i32) {
    %c0_i32 = arith.constant 0 : i32
    %c0_i32_0 = arith.constant 0 : i32
    %c0_i32_1 = arith.constant 0 : i32
    return %c0_i32, %c0_i32_0 : i32, i32
  }
  func.func @transform_22(%arg0: i32, %arg1: memref<2xi32, #tpu.memory_space<smem>>) -> (i32, i32) {
    %c0_i32 = arith.constant 0 : i32
    %c0_i32_0 = arith.constant 0 : i32
    %c0_i32_1 = arith.constant 0 : i32
    return %c0_i32, %c0_i32_0 : i32, i32
  }
  func.func @transform_23(%arg0: i32, %arg1: memref<2xi32, #tpu.memory_space<smem>>) -> (i32, i32) {
    %c0_i32 = arith.constant 0 : i32
    %c0_i32_0 = arith.constant 0 : i32
    %c0_i32_1 = arith.constant 0 : i32
    return %c0_i32, %c0_i32_0 : i32, i32
  }
  func.func @transform_24(%arg0: i32, %arg1: memref<2xi32, #tpu.memory_space<smem>>) -> (i32, i32) {
    %c0_i32 = arith.constant 0 : i32
    %c0_i32_0 = arith.constant 0 : i32
    %c0_i32_1 = arith.constant 0 : i32
    return %c0_i32, %c0_i32_0 : i32, i32
  }
  func.func @transform_25(%arg0: i32, %arg1: memref<2xi32, #tpu.memory_space<smem>>) -> (i32, i32) {
    %c0_i32 = arith.constant 0 : i32
    %c0_i32_0 = arith.constant 0 : i32
    %c0_i32_1 = arith.constant 0 : i32
    return %c0_i32, %c0_i32_0 : i32, i32
  }
  func.func @transform_26(%arg0: i32, %arg1: memref<2xi32, #tpu.memory_space<smem>>) -> (i32, i32) {
    %c0_i32 = arith.constant 0 : i32
    %c0_i32_0 = arith.constant 0 : i32
    %c0_i32_1 = arith.constant 0 : i32
    return %c0_i32, %c0_i32_0 : i32, i32
  }
  func.func @transform_27(%arg0: i32, %arg1: memref<2xi32, #tpu.memory_space<smem>>) -> (i32, i32) {
    %c0_i32 = arith.constant 0 : i32
    %c0_i32_0 = arith.constant 0 : i32
    %c0_i32_1 = arith.constant 0 : i32
    return %c0_i32, %c0_i32_0 : i32, i32
  }
  func.func @transform_28(%arg0: i32, %arg1: memref<2xi32, #tpu.memory_space<smem>>) -> (i32, i32, i32) {
    %c0_i32 = arith.constant 0 : i32
    %c0_i32_0 = arith.constant 0 : i32
    %c0_i32_1 = arith.constant 0 : i32
    return %arg0, %c0_i32, %c0_i32_0 : i32, i32, i32
  }
}

</mosaic_0001>

<bundles_post_ra>
// kernel: nmpnet_forward.1
= control target key start
LH: loop header
LB: loop body
LE: loop exit
PB: predicated region body
PF: predicated region fallthrough
CT: control target
= control target key end

     0   :  { %s2418_s6 = smov 1   ;;  %s2419_s10 = smov 2   ;;  %s2764_s0 = inlined_call_operand.smem [shape: u32[30], index: -1, kind: input, shape index: {}] }
   0x1   :  { %s2460_s5 = sld [smem:[%s2764_s0]]   ;;  %s2420_s14 = smov 3  }
   0x2   :  { %s2465_s9 = sld [smem:[%s2764_s0 + %s2418_s6]]   ;;  %s2421_s18 = smov 4  }
   0x3   :  { %s2470_s13 = sld [smem:[%s2764_s0 + %s2419_s10]]   ;;  %s2422_s22 = smov 5  }
   0x4   :  { %s2475_s17 = sld [smem:[%s2764_s0 + %s2420_s14]]   ;;  %s2423_s26 = smov 6  }
   0x5   :  { %s2480_s21 = sld [smem:[%s2764_s0 + %s2421_s18]]   ;;  %s2424_s30 = smov 7  }
   0x6   :  { %s2485_s25 = sld [smem:[%s2764_s0 + %s2422_s22]]   ;;  %s2425_s4 = smov 8  }
   0x7   :  { %s2490_s29 = sld [smem:[%s2764_s0 + %s2423_s26]]   ;;  %s2426_s10 = smov 9  }
   0x8   :  { %s2495_s3 = sld [smem:[%s2764_s0 + %s2424_s30]]   ;;  %s2427_s15 = smov 10  }
   0x9   :  { %s2500_s8 = sld [smem:[%s2764_s0 + %s2425_s4]]   ;;  %s2428_s20 = smov 11  }
   0xa   :  { %s2505_s14 = sld [smem:[%s2764_s0 + %s2426_s10]]   ;;  %s2429_s26 = smov 12  }
   0xb   :  { %s2510_s19 = sld [smem:[%s2764_s0 + %s2427_s15]]   ;;  %s2430_s1 = smov 13  }
   0xc   :  { %s2515_s24 = sld [smem:[%s2764_s0 + %s2428_s20]]   ;;  %s2431_s7 = smov 14  }
   0xd   :  { %s2520_s30 = sld [smem:[%s2764_s0 + %s2429_s26]]   ;;  %s2432_s15 = smov 15  }
   0xe   :  { %s2525_s6 = sld [smem:[%s2764_s0 + %s2430_s1]]   ;;  %s2433_s22 = smov 16  }
   0xf   :  { %s2530_s12 = sld [smem:[%s2764_s0 + %s2431_s7]]   ;;  %s2434_s28 = smov 17  }
  0x10   :  { %s2535_s20 = sld [smem:[%s2764_s0 + %s2432_s15]]   ;;  %s2435_s7 = smov 18  }
  0x11   :  { %s2540_s27 = sld [smem:[%s2764_s0 + %s2433_s22]]   ;;  %s2436_s15 = smov 19  }
  0x12   :  { %s2545_s4 = sld [smem:[%s2764_s0 + %s2434_s28]]   ;;  %s2437_s22 = smov 20  }
  0x13   :  { %s2560_s1 = sld [smem:[%s2764_s0 + %s2437_s22]]   ;;  %s2438_s28 = smov 21  }
  0x14   :  { %s2565_s10 = sld [smem:[%s2764_s0 + %s2438_s28]]   ;;  %s2441_s22 = smov 24  }
  0x15   :  { %2771 = sst [smem:[#allocation5_spill]] %s2530_s12  ;;  %s2445_s26 = smov 28  }
  0x16   :  { %2772 = sst [smem:[#allocation6_spill]] %s2535_s20  ;;  %s2446_s2 = smov 29  }
  0x17   :  { %2773 = sst [smem:[#allocation7_spill]] %s2540_s27  ;;  %s2442_s27 = smov 25  }
  0x18   :  { %2774 = sst [smem:[#allocation8_spill]] %s2545_s4 }
  0x19   :  { %s2550_s12 = sld [smem:[%s2764_s0 + %s2435_s7]]   ;;  %s2439_s7 = smov 22  }
  0x1a   :  { %s2555_s20 = sld [smem:[%s2764_s0 + %s2436_s15]]   ;;  %s2440_s15 = smov 23  }
  0x1b   :  { %2777 = sst [smem:[#allocation11_spill]] %s2560_s1 }
  0x1c   :  { %2778 = sst [smem:[#allocation12_spill]] %s2565_s10 }
  0x1d   :  { %s2570_s16 = sld [smem:[%s2764_s0 + %s2439_s7]]   ;;  %s2443_s7 = smov 26  }
  0x1e   :  { %s2575_s23 = sld [smem:[%s2764_s0 + %s2440_s15]]   ;;  %s2444_s15 = smov 27  }
  0x1f   :  { %2775 = sst [smem:[#allocation9_spill]] %s2550_s12 }
  0x20   :  { %2776 = sst [smem:[#allocation10_spill]] %s2555_s20 }
  0x21   :  { %s2580_s4 = sld [smem:[%s2764_s0 + %s2441_s22]]   ;;  %s65_s22 = sshll.u32 %s2460_s5, 4  ;;  %s66_s22 = int_to_ptr.vmem [resolvable:$true] %s65_s22 }
  0x22   :  { %s2585_s12 = sld [smem:[%s2764_s0 + %s2442_s27]]  }
  0x23   :  { %2779 = sst [smem:[#allocation13_spill]] %s2570_s16 }
  0x24   :  { %2780 = sst [smem:[#allocation14_spill]] %s2575_s23  ;;  %s2400_s23 = scalar_lea.vmem %s2460_s5, 1 }
  0x25   :  { %s2590_s20 = sld [smem:[%s2764_s0 + %s2443_s7]]   ;;  %s2396_s7 = sshra.s32 %s66_s22, 4  ;;  %s2397_s7 = int_to_ptr.vmem [resolvable:$true] %s2396_s7 }
  0x26   :  { %s2595_s1 = sld [smem:[%s2764_s0 + %s2444_s15]]   ;;  %s2398_s11 = scalar_lea.vmem %s2397_s7, 1 }
  0x27   :  { %2781 = sst [smem:[#allocation15_spill]] %s2580_s4  ;;  %p2399_p0 = scmp.ne.s32.totalorder %s2397_s7, %s2398_s11 }
  0x28   :  { %2782 = sst [smem:[#allocation16_spill]] %s2585_s12  ;;  %p2401_p1 = scmp.lt.s32.totalorder %s2397_s7, %s2460_s5 }
  0x29   :  { %s2601_s27 = sld [smem:[%s2764_s0 + %s2445_s26]]   ;;  %p2402_p2 = scmp.lt.s32.totalorder %s2400_s23, %s2398_s11 }
  0x2a   :  { %s2606_s16 = sld [smem:[%s2764_s0 + %s2446_s2]]  }
  0x2b   :  { %p2403_p3 = por %p2402_p2, %p2401_p1 }
  0x2d   :  { %p2404_p4 = pnand %p2403_p3, %p2399_p0 }
  0x2f   :  { %2407 = shalt.err (!%p2404_p4)  }
  0x30   :  { %s2447_s4 = smov [#allocation3]  }
  0x31   :  { %68 = dma.vmem_to_smem %s66_s22, 16, %s2447_s4, [#allocation2] }
  0x32   :  { %2412 = dma.done.wait [#allocation2], 16 }
  0x33   :  { %2413 = vsyncadd [#allocation2], 4294967280 }
  0x34   :  { %71 = sfence }
  0x35   :  { %s2610_s15 = smov 0  }
  0x36 LB: > { %s2616_s0 = sadd.s32 4294967295, %s2416_s15   ;;  %p1966_p5 = scmp.ge.s32.totalorder %s2416_s15, 1  ;;  %s2416_s15 = sphi %s2610_s15, %s77_s15  }
  0x37   : > { %p809_p6 = scmp.lt.s32.totalorder %s2416_s15, 3 }
  0x39   : > { %p810_p7 = pnand %p1966_p5, %p809_p6 }
  0x3a   : > { %p885_p8 = scmp.lt.s32.totalorder (!%p810_p7), %s2616_s0, 1  ;;  %s2450_s22 = smov (!%p810_p7), 32  }
  0x3b   : > { %813 = sbr.rel (%p810_p7) target bundleno = 2227 (0x8b3), region = 132  ;;  %s2451_s26 = smov (!%p810_p7), 64  }
  0x3c   : > { %s898_s28 = sld [smem:[#allocation3 + %s2616_s0]] (!%p810_p7) }
  0x40   : > { %v2448_v0 = vmov 1   ;;  %v2449_v1 = vmov 0   ;;  %s886_s5 = scalar_select %p885_p8, %s2616_s0, 1  ;;  %vm904_vm0 = vcmask 1043456   ;;  %v2255_v21 = vld [vmem:[%s2485_s25 + $0x28] sm:$0xff]  ;;  %v2254_v22 = vld [vmem:[%s2485_s25 + $0x20] sm:$0xff] }
  0x41   : > { %2361 = vset.pattern.permute.xlu1 %v2448_v0  ;;  %2360 = vset.pattern.permute.xlu0 %v2449_v1  ;;  %v2253_v23 = vld [vmem:[%s2485_s25 + $0x18] sm:$0xff]  ;;  %v914_v24 = vld [vmem:[%s2475_s17] sm:$0x3]  ;;  %v2252_v41 = vld [vmem:[%s2485_s25 + $0x10] sm:$0xff]  ;;  %vm965_vm1 = vcmask 261120   ;;  %vm976_vm2 = vcmask 523264  }
  0x42   : > { %s2622_s10 = sshll.u32 %s886_s5, 2  ;;  %1038 = vmatpush.bf16.msra.mxu0 %v2255_v21  ;;  %v937_v27 = vperm.slane %v914_v24, 1  ;;  %v926_v28 = vperm.slane %v914_v24, 0  ;;  %v2383_v33 = vld [vmem:[%s2480_s21] ss:$0 sm:$0xff]  ;;  %v2251_v42 = vld [vmem:[%s2485_s25 + $0x8] sm:$0xff] }
  0x43   : > { %s892_s12 = scalar_lea.vmem %s2470_s13, %s2622_s10  ;;  %s888_s18 = scalar_lea.vmem %s2465_s9, %s2622_s10  ;;  %v2250_v43 = vld [vmem:[%s2485_s25] sm:$0xff]  ;;  %v2263_v44 = vld [vmem:[%s2495_s3 + $0x38] sm:$0xff]  ;;  %v2262_v45 = vld [vmem:[%s2495_s3 + $0x30] sm:$0xff]  ;;  %vm1032_vm3 = vcmask 785408  }
  0x44   : > { %v900_v2 = vld [vmem:[%s892_s12] sm:$0xf]  ;;  %1119 = vmatpush.bf16.msra.mxu1 %v2263_v44  ;;  %v2261_v46 = vld [vmem:[%s2495_s3 + $0x28] sm:$0xff]  ;;  %v2259_v48 = vld [vmem:[%s2495_s3 + $0x18] sm:$0xff]  ;;  %p1139_p9 = scmp.gt.s32.totalorder %s898_s28, 1  ;;  %p1133_p10 = scmp.gt.s32.totalorder %s898_s28, 0 }
  0x45   : > { %v902_v3 = vrot.slane %v900_v2, 4  ;;  %v906_v4 = vperm.slane %v900_v2, 0  ;;  %v907_v5 = vperm.slane %v900_v2, 1  ;;  %v908_v7 = vperm.slane %v900_v2, 2  ;;  %v899_v13 = vld [vmem:[%s888_s18] sm:$0xf] }
  0x46   : > { %v909_v8 = vperm.slane %v900_v2, 3  ;;  %v951_v14 = vperm.slane %v899_v13, 0  ;;  %v952_v15 = vperm.slane %v899_v13, 1  ;;  %v953_v16 = vperm.slane %v899_v13, 2  ;;  %1039 = vmatpush.bf16.msra.mxu0 %v2254_v22  ;;  %v2260_v47 = vld [vmem:[%s2495_s3 + $0x20] sm:$0xff]  ;;  %v2258_v62 = vld [vmem:[%s2495_s3 + $0x10] sm:$0xff] }
  0x47   : > { %v905_v6 = vsel %vm904_vm0, %v900_v2, %v902_v3  ;;  %v910_v9 = vsel %vm904_vm0, %v906_v4, %v907_v5  ;;  %v954_v17 = vperm.slane %v899_v13, 3  ;;  %v948_v50 = vrot.slane %v899_v13, 4  ;;  %v2257_v63 = vld [vmem:[%s2495_s3 + $0x8] sm:$0xff]  ;;  %v2384_v2 = vld [vmem:[%s2490_s29] ss:$0 sm:$0xff]  ;;  %p1148_p11 = scmp.gt.s32.totalorder %s898_s28, 2 }
  0x48   : > { %v912_v10 = vsub.f32 %v905_v6, %v910_v9  ;;  %v911_v11 = vsel %vm904_vm0, %v908_v7, %v909_v8  ;;  %v955_v18 = vsel %vm904_vm0, %v951_v14, %v952_v15  ;;  %1120 = vmatpush.bf16.msra.mxu1 %v2262_v45  ;;  %v2265_v7 = vld [vmem:[%s2505_s14 + $0x8] sm:$0xff]  ;;  %v2264_v8 = vld [vmem:[%s2505_s14] sm:$0xff]  ;;  %v2273_v9 = vld [vmem:[%s2515_s24 + $0x38] sm:$0xff]  ;;  %s1140_s2 = scalar_select %p1139_p9, 1, 0 }
  0x49   : > { %v913_v12 = vsub.f32 %v905_v6, %v911_v11  ;;  %v956_v19 = vsel %vm904_vm0, %v953_v16, %v954_v17  ;;  %v950_v53 = vsel %vm904_vm0, %v899_v13, %v948_v50  ;;  %1194 = vmatpush.bf16.msra.mxu2 %v2265_v7  ;;  %1270 = vmatpush.bf16.msra.mxu3 %v2273_v9  ;;  %v2271_v11 = vld [vmem:[%s2515_s24 + $0x28] sm:$0xff]  ;;  %p1154_p12 = scmp.gt.s32.totalorder %s898_s28, 3  ;;  %v2270_v13 = vld [vmem:[%s2515_s24 + $0x20] sm:$0xff]  ;;  %v2268_v21 = vld [vmem:[%s2515_s24 + $0x10] sm:$0xff]  ;;  %s2783_s18 = sld [smem:[#allocation6_spill]] }
  0x4a   : > { %930 = vperm.xlu1 %2361, %v912_v10   ;;  %918 = vperm.xlu0 %2360, %v912_v10   ;;  %v2362_v20 = vpack.i.bf16 %v956_v19, %v955_v18  ;;  %v2272_v10 = vld [vmem:[%s2515_s24 + $0x30] sm:$0xff]  ;;  %s1141_s7 = scvt.s32.f32 %s1140_s2  ;;  %v2269_v18 = vld [vmem:[%s2515_s24 + $0x18] sm:$0xff]  ;;  %v2275_v44 = vld [vmem:[%s2525_s6 + $0x8] sm:$0xff]  ;;  %s2785_s28 = sld [smem:[#allocation8_spill]] }
  0x4b   : > { %1040 = vmatpush.bf16.msra.mxu0 %v2253_v23  ;;  %s1134_s11 = scalar_select %p1133_p10, 1, 0  ;;  %v2387_v45 = vld [vmem:[%s2520_s30] ss:$0 sm:$0xff] }
  0x4c   : > { %2363 = vrot.lane.b32.xlu2 %v2362_v20, %s2450_s22  ;;  %1121 = vmatpush.bf16.msra.mxu1 %v2261_v46  ;;  %s1149_s23 = scalar_select %p1148_p11, 1, 0  ;;  %v2664_v15 = vstv %s1141_s7 }
  0x4d   : > { %1195 = vmatpush.bf16.msra.mxu2 %v2264_v8  ;;  %1271 = vmatpush.bf16.msra.mxu3 %v2272_v10  ;;  %s1155_s4 = scalar_select %p1154_p12, 1, 0 }
  0x4e   : > { %s1135_s0 = scvt.s32.f32 %s1134_s11  ;;  %s1150_s5 = scvt.s32.f32 %s1149_s23 }
  0x4f   : > { %1041 = vmatpush.bf16.msra.mxu0 %v2252_v41  ;;  %s1156_s12 = scvt.s32.f32 %s1155_s4  ;;  %s2786_s2 = sld [smem:[#allocation10_spill]]  ;;  %v2279_v7 = vld [vmem:[%s2783_s18 + $0x8] sm:$0xff]  ;;  %v2278_v8 = vld [vmem:[%s2783_s18] sm:$0xff] }
  0x50   : > { %1122 = vmatpush.bf16.msra.mxu1 %v2260_v47  ;;  %v2668_v19 = vstv %s1135_s0  ;;  %v2671_v23 = vstv %s1150_s5  ;;  %s2787_s7 = sld [smem:[#allocation7_spill]] }
  0x51   : > { %1272 = vmatpush.bf16.msra.mxu3 %v2271_v11  ;;  %v2673_v24 = vstv %s1156_s12  ;;  %s2788_s11 = sld [smem:[#allocation9_spill]] }
  0x52   : > { %934 = vperm.xlu1 %2361, %v913_v12   ;;  %923 = vperm.xlu0 %2360, %v913_v12   ;;  %v2385_v12 = vld [vmem:[%s2500_s8] ss:$0 sm:$0xff]  ;;  %s2789_s23 = sld [smem:[#allocation12_spill]] }
  0x53   : > { %1042 = vmatpush.bf16.msra.mxu0 %v2251_v42  ;;  %v2277_v42 = vld [vmem:[%s2525_s6 + $0x18] sm:$0xff]  ;;  %s2790_s4 = sld [smem:[#allocation11_spill]] }
  0x54   : > { %1123 = vmatpush.bf16.msra.mxu1 %v2259_v48  ;;  %1347 = vmatpush.bf16.msrb.mxu2 %v2277_v42  ;;  %s2791_s0 = sld [smem:[#allocation14_spill]] }
  0x55   : > { %1273 = vmatpush.bf16.msra.mxu3 %v2270_v13  ;;  %s2792_s5 = sld [smem:[#allocation13_spill]] }
  0x56   : > { %s2794_s12 = sld [smem:[#allocation15_spill]] }
  0x57   : > { %1043 = vmatpush.bf16.msra.mxu0 %v2250_v43  ;;  %v2276_v43 = vld [vmem:[%s2525_s6 + $0x10] sm:$0xff] }
  0x58   : > { %1124 = vmatpush.bf16.msra.mxu1 %v2258_v62  ;;  %1348 = vmatpush.bf16.msrb.mxu2 %v2276_v43 }
  0x59   : > { %1274 = vmatpush.bf16.msra.mxu3 %v2269_v18  ;;  %v2295_v18 = vld [vmem:[%s2786_s2 + $0x38] sm:$0xff] }
  0x5a   : > { %2382 = vset.pattern.permute.xlu0 %v2448_v0  ;;  %v2256_v0 = vld [vmem:[%s2495_s3] sm:$0xff] }
  0x5c   : > { %1125 = vmatpush.bf16.msra.mxu1 %v2257_v63  ;;  %1349 = vmatpush.bf16.msrb.mxu2 %v2275_v44  ;;  %v2288_v44 = vld [vmem:[%s2786_s2] sm:$0xff] }
  0x5d   : > { %1275 = vmatpush.bf16.msra.mxu3 %v2268_v21  ;;  %v2293_v21 = vld [vmem:[%s2786_s2 + $0x28] sm:$0xff] }
  0x60   : > { %1126 = vmatpush.bf16.msra.mxu1 %v2256_v0 }
  0x64   : > { %1561 = vmatpush.bf16.msrb.mxu1 %v2295_v18 }
  0xa6   : > { %v2364_v49 = vpop.permute.xlu2 %2363 }
  0xa7   : > { %v2366_v51 = vunpack.i.h.bf16 %v2364_v49  ;;  %v2365_v52 = vunpack.i.l.bf16 %v2364_v49 }
  0xa9   : > { %v966_v57 = vsel %vm965_vm1, %v950_v53, %v2365_v52  ;;  %v967_v58 = vsel %vm965_vm1, %v950_v53, %v2366_v51 }
  0xbc   : > { %v931_v25 = vpop.permute.xlu1 %930  ;;  %v919_v26 = vpop.permute.xlu0 %918 }
  0xbd   : > { %v938_v29 = vmul.f32 %v937_v27, %v931_v25  ;;  %v927_v30 = vmul.f32 %v926_v28, %v919_v26 }
  0xbf   : > { %v940_v34 = vadd.f32 %v938_v29, %v927_v30  ;;  %v2267_v30 = vld [vmem:[%s2515_s24 + $0x8] sm:$0xff] }
  0xc0   : > { %1276 = vmatpush.bf16.msra.mxu3 %v2267_v30 }
  0xc1   : > { %v945_v38 = vadd.f32 %v2383_v33, %v940_v34 }
  0xc4   : > { %v935_v31 = vpop.permute.xlu1 %934  ;;  %v924_v32 = vpop.permute.xlu0 %923 }
  0xc5   : > { %v939_v35 = vmul.f32 %v937_v27, %v935_v31  ;;  %v928_v36 = vmul.f32 %v926_v28, %v924_v32 }
  0xc7   : > { %v941_v37 = vadd.f32 %v939_v35, %v928_v36  ;;  %v2266_v36 = vld [vmem:[%s2515_s24] sm:$0xff] }
  0xc8   : > { %1277 = vmatpush.bf16.msra.mxu3 %v2266_v36 }
  0xc9   : > { %v946_v39 = vadd.f32 %v2383_v33, %v941_v37  ;;  %v2386_v37 = vld [vmem:[%s2510_s19] ss:$0 sm:$0xff] }
  0xcb   : > { %v2367_v40 = vpack.i.bf16 %v946_v39, %v945_v38 }
  0xcd   : > { %2368 = vrot.lane.b32.xlu2 %v2367_v40, %s2451_s26  ;;  %s2784_s26 = sld [smem:[#allocation5_spill]] }
  0xd3   : > { %v2388_v10 = vld [vmem:[%s2784_s26] ss:$0 sm:$0xff]  ;;  %s896_s26 = scalar_lea.vmem %s2606_s16, %s2622_s10 }
 0x127   : > { %v2369_v54 = vpop.permute.xlu2 %2368 }
 0x128   : > { %v2371_v55 = vunpack.i.h.bf16 %v2369_v54  ;;  %v2370_v56 = vunpack.i.l.bf16 %v2369_v54 }
 0x12a   : > { %v977_v59 = vsel %vm976_vm2, %v966_v57, %v2370_v56  ;;  %v978_v60 = vsel %vm976_vm2, %v967_v58, %v2371_v55  ;;  %v2274_v56 = vld [vmem:[%s2525_s6] sm:$0xff]  ;;  %v2285_v57 = vld [vmem:[%s2783_s18 + $0x38] sm:$0xff]  ;;  %v2284_v58 = vld [vmem:[%s2783_s18 + $0x30] sm:$0xff] }
 0x12b   : > { %v979_v61 = vpack.c.bf16 %v978_v60, %v977_v59  ;;  %1350 = vmatpush.bf16.msrb.mxu2 %v2274_v56  ;;  %1426 = vmatpush.bf16.msrb.mxu0 %v2285_v57  ;;  %v2283_v59 = vld [vmem:[%s2783_s18 + $0x28] sm:$0xff]  ;;  %v2282_v60 = vld [vmem:[%s2783_s18 + $0x20] sm:$0xff] }
 0x12d   : > { %1994 = vmatmul.msk.bf16.vlgmr.msra.gmra.mxu0 %vm1032_vm3, %v979_v61  ;;  %v2281_v61 = vld [vmem:[%s2783_s18 + $0x18] sm:$0xff] }
 0x12f   : > { %1427 = vmatpush.bf16.msrb.mxu0 %v2284_v58 }
 0x133   : > { %1428 = vmatpush.bf16.msrb.mxu0 %v2283_v59 }
 0x137   : > { %1429 = vmatpush.bf16.msrb.mxu0 %v2282_v60 }
 0x13b   : > { %1430 = vmatpush.bf16.msrb.mxu0 %v2281_v61 }
 0x1aa   : > { %v1045_v1 = vpop.f32.mrf.mxu0 }
 0x1ab   : > { %v1046_v4 = vadd.f32 %v2384_v2, %v1045_v1 }
 0x1b2   : > { %v1047_v3 = vpop.f32.mrf.mxu0 }
 0x1b3   : > { %v1048_v5 = vadd.f32 %v2384_v2, %v1047_v3 }
 0x1b5   : > { %v1050_v6 = vpack.c.bf16 %v1048_v5, %v1046_v4 }
 0x1b7   : > { %1127 = vmatmul.bf16.vlgmr.msra.gmra.mxu1 %v1050_v6  ;;  %v2280_v6 = vld [vmem:[%s2783_s18 + $0x10] sm:$0xff] }
 0x1b8   : > { %1431 = vmatpush.bf16.msrb.mxu0 %v2280_v6 }
 0x1bc   : > { %1432 = vmatpush.bf16.msrb.mxu0 %v2279_v7 }
 0x1c0   : > { %1433 = vmatpush.bf16.msrb.mxu0 %v2278_v8 }
 0x234   : > { %v1128_v14 = vpop.f32.mrf.mxu1 }
 0x235   : > { %v1129_v16 = vadd.f32 %v2385_v12, %v1128_v14 }
 0x237   : > { %v1143_v17 = vmul.f32 %v2664_v15, %v1129_v16  ;;  %v1137_v25 = vmul.f32 %v2668_v19, %v1129_v16  ;;  %v2287_v16 = vld [vmem:[%s2785_s28 + $0x8] sm:$0xff] }
 0x239   : > { %v1145_v20 = vrot.slane %v1143_v17, 4  ;;  %v2286_v17 = vld [vmem:[%s2785_s28] sm:$0xff] }
 0x23b   : > { %v1147_v27 = vadd.f32 %v1145_v20, %v1137_v25  ;;  %v2294_v20 = vld [vmem:[%s2786_s2 + $0x30] sm:$0xff]  ;;  %v2292_v25 = vld [vmem:[%s2786_s2 + $0x20] sm:$0xff] }
 0x23c   : > { %v1130_v22 = vpop.f32.mrf.mxu1  ;;  %1562 = vmatpush.bf16.msrb.mxu1 %v2294_v20  ;;  %v2392_v20 = vld [vmem:[%s2792_s5] ss:$0 sm:$0xff] }
 0x23d   : > { %v1131_v26 = vadd.f32 %v2385_v12, %v1130_v22  ;;  %v2389_v22 = vld [vmem:[%s2787_s7] ss:$0 sm:$0xff] }
 0x23f   : > { %v1152_v28 = vmul.f32 %v2671_v23, %v1131_v26  ;;  %v1158_v29 = vmul.f32 %v2673_v24, %v1131_v26 }
 0x240   : > { %1563 = vmatpush.bf16.msrb.mxu1 %v2293_v21 }
 0x241   : > { %v1153_v31 = vadd.f32 %v1152_v28, %v1147_v27  ;;  %v1160_v32 = vrot.slane %v1158_v29, 4  ;;  %v2291_v29 = vld [vmem:[%s2786_s2 + $0x18] sm:$0xff] }
 0x243   : > { %v1162_v33 = vadd.f32 %v1160_v32, %v1153_v31  ;;  %v2290_v31 = vld [vmem:[%s2786_s2 + $0x10] sm:$0xff] }
 0x244   : > { %1564 = vmatpush.bf16.msrb.mxu1 %v2292_v25 }
 0x245   : > { %v1163_v34 = vmul.f32 0.03125, %v1162_v33 }
 0x247   : > { %v1164_v35 = vpack.c.bf16 %v1163_v34, %v1163_v34 }
 0x248   : > { %1565 = vmatpush.bf16.msrb.mxu1 %v2291_v29  ;;  %v2317_v29 = vld [vmem:[%s2595_s1 + $0x38] sm:$0xff] }
 0x249   : > { %2035 = vmatmul.msk.bf16.vlgmr.msra.gmra.mxu2 %vm965_vm1, %v1164_v35  ;;  %1853 = vmatpush.bf16.msra.mxu0 %v2317_v29 }
 0x24a   : > { %1485 = vmatpush.bf16.msra.mxu2 %v2287_v16  ;;  %v2301_v16 = vld [vmem:[%s2791_s0 + $0x8] sm:$0xff] }
 0x24c   : > { %1566 = vmatpush.bf16.msrb.mxu1 %v2290_v31  ;;  %v2315_v31 = vld [vmem:[%s2595_s1 + $0x28] sm:$0xff] }
 0x24e   : > { %1486 = vmatpush.bf16.msra.mxu2 %v2286_v17  ;;  %v2300_v17 = vld [vmem:[%s2791_s0] sm:$0xff] }
 0x2cc   : > { %v1197_v38 = vpop.f32.mrf.mxu2 }
 0x2cd   : > { %v1198_v39 = vadd.f32 %v2386_v37, %v1197_v38  ;;  %v2289_v38 = vld [vmem:[%s2786_s2 + $0x8] sm:$0xff] }
 0x2ce   : > { %1567 = vmatpush.bf16.msrb.mxu1 %v2289_v38 }
 0x2cf   : > { %v1201_v40 = vpack.c.bf16 %v1198_v39, %v1198_v39 }
 0x2d1   : > { %1278 = vmatmul.bf16.vlgmr.msra.gmra.mxu3 %v1201_v40 }
 0x2d2   : > { %1568 = vmatpush.bf16.msrb.mxu1 %v2288_v44 }
 0x2d4   : > { %v1199_v41 = vpop.f32.mrf.mxu2 }
 0x354   : > { %v1279_v46 = vpop.f32.mrf.mxu3 }
 0x355   : > { %v1280_v47 = vadd.f32 %v2387_v45, %v1279_v46  ;;  %v2390_v45 = vld [vmem:[%s2788_s11] ss:$0 sm:$0xff] }
 0x357   : > { %v1287_v48 = vperm.slane %v1280_v47, 0  ;;  %v1288_v49 = vperm.slane %v1280_v47, 1  ;;  %v1289_v50 = vperm.slane %v1280_v47, 2  ;;  %v1290_v51 = vperm.slane %v1280_v47, 3 }
 0x358   : > { %v1284_v62 = vrot.slane %v1280_v47, 4 }
 0x359   : > { %v1291_v52 = vsel %vm904_vm0, %v1287_v48, %v1288_v49  ;;  %v1292_v53 = vsel %vm904_vm0, %v1289_v50, %v1290_v51  ;;  %v2299_v50 = vld [vmem:[%s2789_s23 + $0x18] sm:$0xff]  ;;  %v2298_v51 = vld [vmem:[%s2789_s23 + $0x10] sm:$0xff] }
 0x35a   : > { %v2372_v54 = vpack.i.bf16 %v1292_v53, %v1291_v52  ;;  %v1286_v2 = vsel %vm904_vm0, %v1280_v47, %v1284_v62  ;;  %1638 = vmatpush.bf16.msrb.mxu3 %v2299_v50  ;;  %v2297_v52 = vld [vmem:[%s2789_s23 + $0x8] sm:$0xff]  ;;  %v2391_v53 = vld [vmem:[%s2790_s4] ss:$0 sm:$0xff] }
 0x35b   : > { %v2311_v50 = vld [vmem:[%s2595_s1 + $0x8] sm:$0xff] }
 0x35c   : > { %v1281_v55 = vpop.f32.mrf.mxu3  ;;  %2373 = vrot.lane.b32.xlu0 %v2372_v54, %s2450_s22 }
 0x35e   : > { %1639 = vmatpush.bf16.msrb.mxu3 %v2298_v51  ;;  %v2394_v51 = vld [vmem:[%s2590_s20] ss:$0 sm:$0xff] }
 0x362   : > { %1640 = vmatpush.bf16.msrb.mxu3 %v2297_v52 }
 0x3ce   : > { %v2374_v63 = vpop.permute.xlu0 %2373 }
 0x3cf   : > { %v2376_v0 = vunpack.i.h.bf16 %v2374_v63  ;;  %v2375_v1 = vunpack.i.l.bf16 %v2374_v63 }
 0x3d1   : > { %v1301_v3 = vsel %vm965_vm1, %v1286_v2, %v2375_v1  ;;  %v1302_v4 = vsel %vm965_vm1, %v1286_v2, %v2376_v0  ;;  %v2296_v0 = vld [vmem:[%s2789_s23] sm:$0xff]  ;;  %v2307_v1 = vld [vmem:[%s2791_s0 + $0x38] sm:$0xff]  ;;  %v2306_v2 = vld [vmem:[%s2791_s0 + $0x30] sm:$0xff] }
 0x3d2   : > { %v1303_v5 = vpack.c.bf16 %v1302_v4, %v1301_v3  ;;  %1641 = vmatpush.bf16.msrb.mxu3 %v2296_v0  ;;  %v2305_v3 = vld [vmem:[%s2791_s0 + $0x28] sm:$0xff]  ;;  %v2304_v4 = vld [vmem:[%s2791_s0 + $0x20] sm:$0xff] }
 0x3d4   : > { %2084 = vmatmul.msk.bf16.vlgmr.msrb.gmra.mxu2 %vm976_vm2, %v1303_v5  ;;  %v2303_v5 = vld [vmem:[%s2791_s0 + $0x18] sm:$0xff] }
 0x3d5   : > { %1717 = vmatpush.bf16.msrb.mxu2 %v2307_v1 }
 0x3d9   : > { %1718 = vmatpush.bf16.msrb.mxu2 %v2306_v2 }
 0x3dd   : > { %1719 = vmatpush.bf16.msrb.mxu2 %v2305_v3 }
 0x3e1   : > { %1720 = vmatpush.bf16.msrb.mxu2 %v2304_v4 }
 0x3e5   : > { %1721 = vmatpush.bf16.msrb.mxu2 %v2303_v5 }
 0x457   : > { %v1352_v9 = vpop.f32.mrf.mxu2 }
 0x458   : > { %v1353_v12 = vadd.f32 %v2388_v10, %v1352_v9 }
 0x45f   : > { %v1354_v11 = vpop.f32.mrf.mxu2 }
 0x460   : > { %v1355_v13 = vadd.f32 %v2388_v10, %v1354_v11 }
 0x462   : > { %v1357_v14 = vpack.c.bf16 %v1355_v13, %v1353_v12 }
 0x464   : > { %1434 = vmatmul.bf16.vlgmr.msrb.gmra.mxu0 %v1357_v14  ;;  %v2302_v14 = vld [vmem:[%s2791_s0 + $0x10] sm:$0xff] }
 0x465   : > { %1722 = vmatpush.bf16.msrb.mxu2 %v2302_v14 }
 0x469   : > { %1723 = vmatpush.bf16.msrb.mxu2 %v2301_v16 }
 0x46d   : > { %1724 = vmatpush.bf16.msrb.mxu2 %v2300_v17 }
 0x4e1   : > { %v1435_v26 = vpop.f32.mrf.mxu0 }
 0x4e2   : > { %v1436_v27 = vadd.f32 %v2389_v22, %v1435_v26 }
 0x4e4   : > { %v1442_v28 = vmul.f32 %v1436_v27, %v2664_v15  ;;  %v1440_v33 = vmul.f32 %v1436_v27, %v2668_v19 }
 0x4e6   : > { %v1444_v30 = vrot.slane %v1442_v28, 4 }
 0x4e8   : > { %v1446_v35 = vadd.f32 %v1444_v30, %v1440_v33  ;;  %v2316_v30 = vld [vmem:[%s2595_s1 + $0x30] sm:$0xff]  ;;  %v2314_v33 = vld [vmem:[%s2595_s1 + $0x20] sm:$0xff] }
 0x4e9   : > { %v1437_v32 = vpop.f32.mrf.mxu0  ;;  %1854 = vmatpush.bf16.msra.mxu0 %v2316_v30 }
 0x4ea   : > { %v1438_v34 = vadd.f32 %v2389_v22, %v1437_v32  ;;  %v2393_v32 = vld [vmem:[%s2794_s12] ss:$0 sm:$0xff] }
 0x4ec   : > { %v1447_v36 = vmul.f32 %v1438_v34, %v2671_v23  ;;  %v1449_v37 = vmul.f32 %v1438_v34, %v2673_v24 }
 0x4ed   : > { %1855 = vmatpush.bf16.msra.mxu0 %v2315_v31 }
 0x4ee   : > { %v1448_v39 = vadd.f32 %v1447_v36, %v1446_v35  ;;  %v1451_v40 = vrot.slane %v1449_v37, 4  ;;  %v2313_v37 = vld [vmem:[%s2595_s1 + $0x18] sm:$0xff] }
 0x4f0   : > { %v1453_v41 = vadd.f32 %v1451_v40, %v1448_v39  ;;  %v2312_v39 = vld [vmem:[%s2595_s1 + $0x10] sm:$0xff] }
 0x4f1   : > { %1856 = vmatpush.bf16.msra.mxu0 %v2314_v33 }
 0x4f2   : > { %v1454_v42 = vmul.f32 0.03125, %v1453_v41 }
 0x4f4   : > { %v1455_v43 = vpack.c.bf16 %v1454_v42, %v1454_v42 }
 0x4f5   : > { %1857 = vmatpush.bf16.msra.mxu0 %v2313_v37 }
 0x4f6   : > { %2125 = vmatmul.msk.bf16.vlgmr.msra.gmra.mxu2 %vm965_vm1, %v1455_v43 }
 0x4f9   : > { %1858 = vmatpush.bf16.msra.mxu0 %v2312_v39 }
 0x4fd   : > { %1859 = vmatpush.bf16.msra.mxu0 %v2311_v50 }
 0x579   : > { %v1488_v46 = vpop.f32.mrf.mxu2 }
 0x57a   : > { %v1489_v47 = vadd.f32 %v2390_v45, %v1488_v46 }
 0x57c   : > { %v1492_v48 = vpack.c.bf16 %v1489_v47, %v1489_v47 }
 0x57e   : > { %1569 = vmatmul.bf16.vlgmr.msrb.gmra.mxu1 %v1492_v48 }
 0x581   : > { %v1490_v49 = vpop.f32.mrf.mxu2 }
 0x5fb   : > { %v1570_v54 = vpop.f32.mrf.mxu1 }
 0x5fc   : > { %v1571_v55 = vadd.f32 %v2391_v53, %v1570_v54 }
 0x5fe   : > { %v1578_v56 = vperm.slane %v1571_v55, 0  ;;  %v1579_v57 = vperm.slane %v1571_v55, 1  ;;  %v1580_v58 = vperm.slane %v1571_v55, 2  ;;  %v1581_v59 = vperm.slane %v1571_v55, 3 }
 0x5ff   : > { %v1575_v6 = vrot.slane %v1571_v55, 4 }
 0x600   : > { %v1582_v60 = vsel %vm904_vm0, %v1578_v56, %v1579_v57  ;;  %v1583_v61 = vsel %vm904_vm0, %v1580_v58, %v1581_v59 }
 0x601   : > { %v2377_v62 = vpack.i.bf16 %v1583_v61, %v1582_v60  ;;  %v1577_v10 = vsel %vm904_vm0, %v1571_v55, %v1575_v6  ;;  %v2395_v55 = vld [vmem:[%s2601_s27] ss:$0 sm:$0xff] }
 0x603   : > { %v1572_v63 = vpop.f32.mrf.mxu1  ;;  %2378 = vrot.lane.b32.xlu1 %v2377_v62, %s2450_s22  ;;  %s2793_s22 = sld [smem:[#allocation16_spill]] }
 0x609   : > { %v2309_v27 = vld [vmem:[%s2793_s22 + $0x8] sm:$0xff]  ;;  %v2308_v28 = vld [vmem:[%s2793_s22] sm:$0xff] }
 0x60a   : > { %1776 = vmatpush.bf16.msra.mxu3 %v2309_v27 }
 0x60e   : > { %1777 = vmatpush.bf16.msra.mxu3 %v2308_v28 }
 0x675   : > { %v2379_v7 = vpop.permute.xlu1 %2378 }
 0x676   : > { %v2381_v8 = vunpack.i.h.bf16 %v2379_v7  ;;  %v2380_v9 = vunpack.i.l.bf16 %v2379_v7 }
 0x678   : > { %v1592_v11 = vsel %vm965_vm1, %v1577_v10, %v2380_v9  ;;  %v1593_v12 = vsel %vm965_vm1, %v1577_v10, %v2381_v8 }
 0x679   : > { %v1594_v13 = vpack.c.bf16 %v1593_v12, %v1592_v11 }
 0x67b   : > { %2174 = vmatmul.msk.bf16.vlgmr.msrb.gmra.mxu3 %vm976_vm2, %v1594_v13 }
 0x6fe   : > { %v1643_v18 = vpop.f32.mrf.mxu3 }
 0x6ff   : > { %v1644_v22 = vadd.f32 %v2392_v20, %v1643_v18 }
 0x706   : > { %v1645_v21 = vpop.f32.mrf.mxu3 }
 0x707   : > { %v1646_v25 = vadd.f32 %v2392_v20, %v1645_v21 }
 0x709   : > { %v1648_v26 = vpack.c.bf16 %v1646_v25, %v1644_v22 }
 0x70b   : > { %1725 = vmatmul.bf16.vlgmr.msrb.gmra.mxu2 %v1648_v26 }
 0x78e   : > { %v1726_v34 = vpop.f32.mrf.mxu2 }
 0x78f   : > { %v1727_v35 = vadd.f32 %v2393_v32, %v1726_v34 }
 0x791   : > { %v1733_v36 = vmul.f32 %v1727_v35, %v2664_v15  ;;  %v1731_v41 = vmul.f32 %v1727_v35, %v2668_v19  ;;  %v2310_v19 = vld [vmem:[%s2595_s1] sm:$0xff] }
 0x792   : > { %1860 = vmatpush.bf16.msra.mxu0 %v2310_v19 }
 0x793   : > { %v1735_v38 = vrot.slane %v1733_v36, 4 }
 0x795   : > { %v1737_v43 = vadd.f32 %v1735_v38, %v1731_v41 }
 0x796   : > { %v1728_v40 = vpop.f32.mrf.mxu2 }
 0x797   : > { %v1729_v42 = vadd.f32 %v2393_v32, %v1728_v40 }
 0x799   : > { %v1738_v44 = vmul.f32 %v1729_v42, %v2671_v23  ;;  %v1740_v45 = vmul.f32 %v1729_v42, %v2673_v24 }
 0x79b   : > { %v1739_v46 = vadd.f32 %v1738_v44, %v1737_v43  ;;  %v1742_v15 = vrot.slane %v1740_v45, 4 }
 0x79d   : > { %v1744_v47 = vadd.f32 %v1742_v15, %v1739_v46 }
 0x79f   : > { %v1745_v48 = vmul.f32 0.03125, %v1744_v47 }
 0x7a1   : > { %v1746_v49 = vpack.c.bf16 %v1745_v48, %v1745_v48 }
 0x7a3   : > { %2215 = vmatmul.msk.bf16.vlgmr.msra.gmra.mxu3 %vm965_vm1, %v1746_v49 }
 0x826   : > { %v1779_v52 = vpop.f32.mrf.mxu3 }
 0x827   : > { %v1780_v23 = vadd.f32 %v2394_v51, %v1779_v52 }
 0x829   : > { %v1783_v53 = vmax.f32 %v1780_v23, 0.0 }
 0x82b   : > { %v1784_v24 = vpack.c.bf16 %v1783_v53, %v1783_v53 }
 0x82d   : > { %1861 = vmatmul.bf16.vlgmr.msra.gmra.mxu0 %v1784_v24 }
 0x82e   : > { %v1781_v54 = vpop.f32.mrf.mxu3 }
 0x8aa   : > { %v1862_v56 = vpop.f32.mrf.mxu0 }
 0x8ab   : > { %v1863_v57 = vadd.f32 %v2395_v55, %v1862_v56 }
 0x8ad   : > { %v1866_v58 = vmax.f32 %v1863_v57, 0.0 }
 0x8af   : > { %1867 = vst [vmem:[%s896_s26] sm:$0xf] %v1866_v58 }
 0x8b2   : > { %v1864_v59 = vpop.f32.mrf.mxu0 }
 0x8b3 PF: > { %s77_s15 = sadd.s32 1, %s2416_s15  }
 0x8b4   : > { %p74_p13 = scmp.ge.s32.totalorder %s77_s15, 4  }
 0x8b6   :  { %76 = sbr.rel (!%p74_p13) target bundleno = 54 (0x36), region = 194 }

</bundles_post_ra>
